<compile_context>
chip_gen: v7x
topology: tpu7x:2x2x1
jax: 0.10.0
libtpu: 0.0.40
codegen_flags: <defaults>
</compile_context>

<pallas_src>
import math

import jax
import jax.numpy as jnp
from jax.experimental import pallas as pl
from jax.experimental.pallas import tpu as pltpu


# ----------------------------------------------------------------------------- head Pallas kernel
N_HID_TILES = 2      # split the 2048 hidden dim in two (maps to both TCs on v7x)
PRED_PAD = 128       # class dim padded to one full lane group -> unmasked stores


def _head_kernel(x_ref, w1_ref, b1_ref, w2_ref, ffs_ref, pred_ref):
    # ffs_tile = x @ w1_tile + b1_tile          (BN1d already folded into w1/b1)
    # pred_partial = ffs_tile @ w2_tile_rows    (partials summed outside; bias added outside)
    x = x_ref[...]                                            # (N, 576) bf16
    ffs = jnp.dot(x, w1_ref[...], preferred_element_type=jnp.float32) + b1_ref[...]
    ffs_ref[...] = ffs                                        # fp32 out
    pred_ref[...] = jnp.dot(ffs.astype(jnp.bfloat16), w2_ref[...],
                            preferred_element_type=jnp.float32)


def head_forward(feat, hp):
    """feat: (N, 576) fp32.  hp holds BN-folded, bf16, class-padded head weights."""
    N, K = feat.shape                         # (batch, 576)
    H = hp["w1"].shape[1]                     # 2048
    C = hp["b2"].shape[1]                     # class_num
    tile = H // N_HID_TILES                   # 1024

    x_bf16 = feat.astype(jnp.bfloat16)

    flops = 2 * N * K * H + 2 * N * H * PRED_PAD
    bytes_accessed = (x_bf16.size * 2 + hp["w1"].size * 2 + hp["b1"].size * 4
                      + hp["w2"].size * 2 + N * H * 4 + N * N_HID_TILES * PRED_PAD * 4)

    ffs, pred_wide = pl.pallas_call(
        _head_kernel,
        out_shape=(jax.ShapeDtypeStruct((N, H), jnp.float32),
                   jax.ShapeDtypeStruct((N, N_HID_TILES * PRED_PAD), jnp.float32)),
        grid=(N_HID_TILES,),
        in_specs=[
            pl.BlockSpec((N, K), lambda j: (0, 0)),            # feat (resident)
            pl.BlockSpec((K, tile), lambda j: (0, j)),          # w1 column tile (bf16)
            pl.BlockSpec((1, tile), lambda j: (0, j)),          # folded bias tile (fp32)
            pl.BlockSpec((tile, PRED_PAD), lambda j: (j, 0)),   # w2 row tile (bf16, padded)
        ],
        out_specs=(
            pl.BlockSpec((N, tile), lambda j: (0, j)),          # ffs column tile
            pl.BlockSpec((N, PRED_PAD), lambda j: (0, j)),      # per-tile pred partial
        ),
        compiler_params=pltpu.CompilerParams(
            dimension_semantics=("parallel",),
            vmem_limit_bytes=16 << 20,
        ),
        cost_estimate=pl.CostEstimate(flops=flops, transcendentals=0,
                                      bytes_accessed=bytes_accessed),
    )(x_bf16, hp["w1"], hp["b1"], hp["w2"])

    # Sum hidden-dim partials, drop the class padding, add the classifier bias.
    pred = pred_wide.reshape(N, N_HID_TILES, PRED_PAD).sum(axis=1)[:, :C] + hp["b2"]
    return ffs, pred


# ----------------------------------------------------------------------------- plain-JAX glue
def conv2d(x, w, stride=1, padding=0, groups=1):
    return jax.lax.conv_general_dilated(
        x, w, window_strides=(stride, stride),
        padding=[(padding, padding), (padding, padding)],
        dimension_numbers=("NHWC", "HWIO", "NHWC"),
        feature_group_count=groups)


def relu(x):
    return jnp.maximum(x, 0.0)


def hardswish(x):
    return x * jnp.clip(x + 3.0, 0.0, 6.0) / 6.0


def hardsigmoid(x):
    return jnp.clip(x + 3.0, 0.0, 6.0) / 6.0


def pointwise(x, w, b):
    # 1x1 conv == matmul over flattened spatial rows.  M = N*H*W is < 128 at these shapes,
    # so per the perf review this stays an XLA dot (fuses with the bias/activation).
    N, H, W, C = x.shape
    y = jnp.dot(x.reshape(N * H * W, C), w) + b
    return y.reshape(N, H, W, w.shape[1])


def _make_divisible(v, divisor=8):
    new_v = max(divisor, int(v + divisor / 2) // divisor * divisor)
    if new_v < 0.9 * v:
        new_v += divisor
    return new_v


# torchvision mobilenet_v3_small inverted-residual config:
# (in_c, kernel, expand_c, out_c, use_se, activation, stride)
BNECK = [
    (16, 3, 16, 16, True, "RE", 2),
    (16, 3, 72, 24, False, "RE", 2),
    (24, 3, 88, 24, False, "RE", 1),
    (24, 5, 96, 40, True, "HS", 2),
    (40, 5, 240, 40, True, "HS", 1),
    (40, 5, 240, 40, True, "HS", 1),
    (40, 5, 120, 48, True, "HS", 1),
    (48, 5, 144, 48, True, "HS", 1),
    (48, 5, 288, 96, True, "HS", 2),
    (96, 5, 576, 96, True, "HS", 1),
    (96, 5, 576, 96, True, "HS", 1),
]


def inverted_residual(x, cnf, p):
    in_c, k, exp_c, out_c, use_se, act, stride = cnf
    act_fn = relu if act == "RE" else hardswish
    y = x
    if exp_c != in_c:
        y = act_fn(pointwise(y, p["expand_w"], p["expand_b"]))
    pad = (k - 1) // 2
    y = conv2d(y, p["dw_w"], stride=stride, padding=pad, groups=exp_c) + p["dw_b"]
    y = act_fn(y)
    if use_se:
        s = jnp.mean(y, axis=(1, 2))                                  # (N, exp_c)
        s = relu(jnp.dot(s, p["se_w1"]) + p["se_b1"])
        s = hardsigmoid(jnp.dot(s, p["se_w2"]) + p["se_b2"])
        y = y * s[:, None, None, :]
    y = pointwise(y, p["proj_w"], p["proj_b"])                        # linear (no act)
    if stride == 1 and in_c == out_c:
        y = y + x
    return y


def backbone_forward(params, x_nhwc):
    p = params["stem"]
    y = hardswish(conv2d(x_nhwc, p["w"], stride=2, padding=1) + p["b"])
    for cnf, bp in zip(BNECK, params["blocks"]):
        y = inverted_residual(y, cnf, bp)
    p = params["last"]
    y = hardswish(pointwise(y, p["w"], p["b"]))                       # 96 -> 576
    return jnp.mean(y, axis=(1, 2))                                    # (N, 576)


@jax.jit
def lightnn_forward(params, x_nchw, cam, view):
    del cam, view  # unused in the PyTorch forward as well
    x = jnp.transpose(x_nchw, (0, 2, 3, 1))          # NCHW -> NHWC
    feat = backbone_forward(params, x)                # (N, 576)
    ffs, pred = head_forward(feat, params["head"])    # (N, 2048), (N, class_num)
    n = ffs.shape[0]
    # torch.empty(N) is uninitialized; represent it deterministically as zeros.
    return pred, None, [ffs], [jnp.zeros((n,), jnp.float32)]


# ----------------------------------------------------------------------------- BN folding (inference)
_BN_EPS = 1e-5


def fold_bn(w, bn, eps=_BN_EPS):
    """Fold an inference BatchNorm into the preceding conv/linear weight.

    Works for HWIO conv weights, depthwise weights and (cin, cout) matmul weights:
    the BN channel axis is always the last weight axis."""
    scale = bn["gamma"] * jax.lax.rsqrt(bn["var"] + eps)      # (cout,)
    w_f = (w * scale).astype(jnp.float32)
    b_f = (bn["beta"] - bn["mean"] * scale).astype(jnp.float32)
    return w_f, b_f


def prepare_inference_params(params):
    """Raw params (conv weights + BN stats) -> folded inference params + bf16 head."""
    prep = {}
    w, b = fold_bn(params["stem"]["w"], params["stem"]["bn"])
    prep["stem"] = dict(w=w, b=b)

    blocks = []
    for cnf, bp in zip(BNECK, params["blocks"]):
        in_c, k, exp_c, out_c, use_se, act, stride = cnf
        nb = {}
        if exp_c != in_c:
            nb["expand_w"], nb["expand_b"] = fold_bn(bp["expand_w"], bp["expand_bn"])
        nb["dw_w"], nb["dw_b"] = fold_bn(bp["dw_w"], bp["dw_bn"])
        if use_se:
            nb["se_w1"], nb["se_b1"] = bp["se_w1"], bp["se_b1"]
            nb["se_w2"], nb["se_b2"] = bp["se_w2"], bp["se_b2"]
        nb["proj_w"], nb["proj_b"] = fold_bn(bp["proj_w"], bp["proj_bn"])
        blocks.append(nb)
    prep["blocks"] = blocks

    w, b = fold_bn(params["last"]["w"], params["last"]["bn"])
    prep["last"] = dict(w=w, b=b)

    # Head: fold BatchNorm1d into (w1, b1); pad the class dim of w2 to 128 lanes;
    # cast matmul weights to bf16 (fp32 accumulation happens inside the kernel).
    hp = params["head"]
    scale = hp["bn_g"] * jax.lax.rsqrt(hp["bn_v"] + _BN_EPS)          # (1, 2048)
    w1_f = hp["w1"] * scale                                           # (576, 2048)
    b1_f = (hp["b1"] - hp["bn_m"]) * scale + hp["bn_b"]               # (1, 2048)
    w2 = hp["w2"]                                                     # (2048, C)
    c = w2.shape[1]
    w2_pad = jnp.zeros((w2.shape[0], PRED_PAD), jnp.float32).at[:, :c].set(w2)
    prep["head"] = dict(
        w1=w1_f.astype(jnp.bfloat16),
        b1=b1_f.astype(jnp.float32),
        w2=w2_pad.astype(jnp.bfloat16),
        b2=hp["b2"].astype(jnp.float32),                              # (1, C)
    )
    return prep


# ----------------------------------------------------------------------------- parameter init
class KeyGen:
    def __init__(self, key):
        self.key = key

    def __call__(self):
        self.key, sub = jax.random.split(self.key)
        return sub


def init_bn(c):
    return dict(gamma=jnp.ones((c,), jnp.float32), beta=jnp.zeros((c,), jnp.float32),
                mean=jnp.zeros((c,), jnp.float32), var=jnp.ones((c,), jnp.float32))


def init_conv(kg, k, cin_per_group, cout):
    std = 1.0 / math.sqrt(max(1, k * k * cin_per_group))
    return (jax.random.normal(kg(), (k, k, cin_per_group, cout)) * std).astype(jnp.float32)


def init_mat(kg, cin, cout):
    std = 1.0 / math.sqrt(cin)
    return (jax.random.normal(kg(), (cin, cout)) * std).astype(jnp.float32)


def init_params(key, class_num):
    kg = KeyGen(key)
    params = {"stem": dict(w=init_conv(kg, 3, 3, 16), bn=init_bn(16))}
    blocks = []
    for (in_c, k, exp_c, out_c, use_se, act, stride) in BNECK:
        bp = {}
        if exp_c != in_c:
            bp["expand_w"] = init_mat(kg, in_c, exp_c)
            bp["expand_bn"] = init_bn(exp_c)
        bp["dw_w"] = init_conv(kg, k, 1, exp_c)
        bp["dw_bn"] = init_bn(exp_c)
        if use_se:
            sq = _make_divisible(exp_c // 4, 8)
            bp["se_w1"] = init_mat(kg, exp_c, sq)
            bp["se_b1"] = jnp.zeros((sq,), jnp.float32)
            bp["se_w2"] = init_mat(kg, sq, exp_c)
            bp["se_b2"] = jnp.zeros((exp_c,), jnp.float32)
        bp["proj_w"] = init_mat(kg, exp_c, out_c)
        bp["proj_bn"] = init_bn(out_c)
        blocks.append(bp)
    params["blocks"] = blocks
    params["last"] = dict(w=init_mat(kg, 96, 576), bn=init_bn(576))
    params["head"] = dict(
        w1=init_mat(kg, 576, 2048),
        b1=(jax.random.normal(kg(), (1, 2048)) * 0.01).astype(jnp.float32),
        bn_g=jnp.ones((1, 2048), jnp.float32), bn_b=jnp.zeros((1, 2048), jnp.float32),
        bn_m=jnp.zeros((1, 2048), jnp.float32), bn_v=jnp.ones((1, 2048), jnp.float32),
        w2=init_mat(kg, 2048, class_num),
        b2=(jax.random.normal(kg(), (1, class_num)) * 0.01).astype(jnp.float32),
    )
    return params


# ----------------------------------------------------------------------------- main
if __name__ == "__main__":
    key = jax.random.PRNGKey(0)
    kp, kx = jax.random.split(key)
    class_num = 10
    batch = 2

    raw_params = init_params(kp, class_num)
    params = prepare_inference_params(raw_params)     # BN folding + bf16/pad head, done once

    x = jax.random.normal(kx, (batch, 3, 16, 16), jnp.float32)   # NCHW like PyTorch
    cam = jnp.zeros((batch,), jnp.int32)
    view = jnp.zeros((batch,), jnp.int32)

    pred, _none, ffs_list, empty_list = lightnn_forward(params, x, cam, view)
    jax.block_until_ready(pred)
    jax.block_until_ready(ffs_list[0])

    assert pred.shape == (batch, class_num)
    assert ffs_list[0].shape == (batch, 2048)
    assert empty_list[0].shape == (batch,)
    assert _none is None
    assert bool(jnp.all(jnp.isfinite(pred)))
    print("KERNEL_OK")
</pallas_src>

<mosaic_0001>
module attributes {stable_mosaic.version = 11 : i64} {
  func.func @_head_kernel(%arg0: i32, %arg1: memref<2x576xbf16, #tpu.memory_space<vmem>>, %arg2: memref<576x1024xbf16, #tpu.memory_space<vmem>>, %arg3: memref<1x1024xf32, #tpu.memory_space<vmem>>, %arg4: memref<1024x128xbf16, #tpu.memory_space<vmem>>, %arg5: memref<2x1024xf32, #tpu.memory_space<vmem>>, %arg6: memref<2x128xf32, #tpu.memory_space<vmem>>) attributes {dimension_semantics = [#tpu.dimension_semantics<parallel>], iteration_bounds = array<i64: 2>, scalar_prefetch = 0 : i64, scratch_operands = 0 : i64, tpu.core_type = #tpu.core_type<tc>, window_params = [{pipeline_mode = #tpu.pipeline_mode<synchronous>, transform_indices = @transform_0, window_bounds = array<i64: 2, 576>}, {transform_indices = @transform_1, window_bounds = array<i64: 576, 1024>}, {transform_indices = @transform_2, window_bounds = array<i64: 1, 1024>}, {transform_indices = @transform_3, window_bounds = array<i64: 1024, 128>}, {transform_indices = @transform_4, window_bounds = array<i64: 2, 1024>}, {transform_indices = @transform_5, window_bounds = array<i64: 2, 128>}]} {
    %c0 = arith.constant 0 : index
    %c0_0 = arith.constant 0 : index
    %0 = vector.load %arg1[%c0, %c0_0] : memref<2x576xbf16, #tpu.memory_space<vmem>>, vector<2x576xbf16>
    %c0_1 = arith.constant 0 : index
    %c0_2 = arith.constant 0 : index
    %1 = vector.load %arg2[%c0_1, %c0_2] : memref<576x1024xbf16, #tpu.memory_space<vmem>>, vector<576x1024xbf16>
    %cst = arith.constant dense<0.000000e+00> : vector<2x1024xf32>
    %2 = tpu.matmul %0, %1, %cst {dimension_numbers = #tpu.dot_dimension_numbers<[1], [0], [0], [1], [0, 0, 1, 1], [], []>} : vector<2x576xbf16>, vector<576x1024xbf16>, vector<2x1024xf32> -> vector<2x1024xf32>
    %c0_3 = arith.constant 0 : index
    %c0_4 = arith.constant 0 : index
    %3 = vector.load %arg3[%c0_3, %c0_4] : memref<1x1024xf32, #tpu.memory_space<vmem>>, vector<1x1024xf32>
    %4 = vector.broadcast %3 : vector<1x1024xf32> to vector<2x1024xf32>
    %5 = arith.addf %2, %4 : vector<2x1024xf32>
    %c0_5 = arith.constant 0 : index
    %c0_6 = arith.constant 0 : index
    %6 = vector.load %arg5[%c0_5, %c0_6] : memref<2x1024xf32, #tpu.memory_space<vmem>>, vector<2x1024xf32>
    tpu.vector_store %arg5[%c0_5, %c0_6], %5 {strides = array<i32>} : memref<2x1024xf32, #tpu.memory_space<vmem>>, vector<2x1024xf32>,
    %7 = arith.truncf %5 : vector<2x1024xf32> to vector<2x1024xbf16>
    %c0_7 = arith.constant 0 : index
    %c0_8 = arith.constant 0 : index
    %8 = vector.load %arg4[%c0_7, %c0_8] : memref<1024x128xbf16, #tpu.memory_space<vmem>>, vector<1024x128xbf16>
    %cst_9 = arith.constant dense<0.000000e+00> : vector<2x128xf32>
    %9 = tpu.matmul %7, %8, %cst_9 {dimension_numbers = #tpu.dot_dimension_numbers<[1], [0], [0], [1], [0, 0, 1, 1], [], []>} : vector<2x1024xbf16>, vector<1024x128xbf16>, vector<2x128xf32> -> vector<2x128xf32>
    %c0_10 = arith.constant 0 : index
    %c0_11 = arith.constant 0 : index
    %10 = vector.load %arg6[%c0_10, %c0_11] : memref<2x128xf32, #tpu.memory_space<vmem>>, vector<2x128xf32>
    tpu.vector_store %arg6[%c0_10, %c0_11], %9 {strides = array<i32>} : memref<2x128xf32, #tpu.memory_space<vmem>>, vector<2x128xf32>,
    return
  }
  func.func @transform_0(%arg0: i32) -> (i32, i32) {
    %c0_i32 = arith.constant 0 : i32
    %c0_i32_0 = arith.constant 0 : i32
    %c0_i32_1 = arith.constant 0 : i32
    return %c0_i32, %c0_i32_0 : i32, i32
  }
  func.func @transform_1(%arg0: i32) -> (i32, i32) {
    %c0_i32 = arith.constant 0 : i32
    %c0_i32_0 = arith.constant 0 : i32
    return %c0_i32, %arg0 : i32, i32
  }
  func.func @transform_2(%arg0: i32) -> (i32, i32) {
    %c0_i32 = arith.constant 0 : i32
    %c0_i32_0 = arith.constant 0 : i32
    return %c0_i32, %arg0 : i32, i32
  }
  func.func @transform_3(%arg0: i32) -> (i32, i32) {
    %c0_i32 = arith.constant 0 : i32
    %c0_i32_0 = arith.constant 0 : i32
    return %arg0, %c0_i32 : i32, i32
  }
  func.func @transform_4(%arg0: i32) -> (i32, i32) {
    %c0_i32 = arith.constant 0 : i32
    %c0_i32_0 = arith.constant 0 : i32
    return %c0_i32, %arg0 : i32, i32
  }
  func.func @transform_5(%arg0: i32) -> (i32, i32) {
    %c0_i32 = arith.constant 0 : i32
    %c0_i32_0 = arith.constant 0 : i32
    return %c0_i32, %arg0 : i32, i32
  }
}

</mosaic_0001>

<bundles_post_ra>
// kernel: lightnn_forward.1
= control target key start
LH: loop header
LB: loop body
LE: loop exit
PB: predicated region body
PF: predicated region fallthrough
CT: control target
= control target key end

     0   :  { %11 = vsyncpa [#allocation4], 0  ;;  %s5899_s0 = inlined_call_operand.vmem [shape: bf16[2,576], index: 0, kind: input, shape index: {}]   ;;  %s5900_s1 = inlined_call_operand.vmem [shape: bf16[576,2048], index: 1, kind: input, shape index: {}]   ;;  %s5901_s2 = inlined_call_operand.vmem [shape: f32[1,2048], index: 2, kind: input, shape index: {}]   ;;  %s5902_s3 = inlined_call_operand.vmem [shape: bf16[2048,128], index: 3, kind: input, shape index: {}]   ;;  %s5903_s4 = inlined_call_operand.hbm [shape: f32[2,2048], index: 4, kind: output, shape index: {0}]   ;;  %s5904_s5 = inlined_call_operand.vmem [shape: f32[2,256], index: 5, kind: output, shape index: {1}]  }
   0x1   :  { %13 = vsyncpa [#allocation4 + $0x1], 0  ;;  %s4751_s18 = smov 0   ;;  %s4753_s19 = smov 0  }
   0x2   :  { %s4755_s20 = smov 0   ;;  %s4757_s21 = smov 0  }
   0x3 LB: > { %s4772_s22 = sadd.s32 4294967295, %s4715_s21   ;;  %s4042_s23 = sadd.s32 4294967294, %s4715_s21   ;;  %s4715_s21 = sphi %s4757_s21, %s5910_s21   ;;  %s4711_s20 = sphi %s4755_s20, %s5909_s20   ;;  %s4707_s19 = sphi %s4753_s19, %s5908_s19   ;;  %s4703_s18 = sphi %s4751_s18, %s5907_s18  }
   0x4   : > { %s4776_s24 = sadd.s32 1, %s4715_s21   ;;  %s47_s25 = sadd.s32 1, %s4711_s20 }
   0x5   : > { %s44_s26 = ssub.s32 %s4715_s21, %s4776_s24  ;;  %p54_p0 = scmp.ne.s32.totalorder %s4711_s20, %s4707_s19 }
   0x6   : > { %p45_p1 = scmp.eq.s32.totalorder %s44_s26, 0  ;;  %p55_p2 = scmp.eq.s32.totalorder %s4715_s21, 0 }
   0x7   : > { %p136_p3 = scmp.eq.s32.totalorder %s4772_s22, 1  ;;  %p141_p4 = scmp.ne.s32.totalorder %s4707_s19, %s4703_s18 }
   0x8   : > { %s4788_s27 = scalar_select %p45_p1, %s4711_s20, %s47_s25  }
   0x9   : > { %p56_p5 = por %p55_p2, %p54_p0  ;;  %p4790_p6 = por %p136_p3, %p54_p0 }
   0xa   : > { %p142_p7 = scmp.eq.s32.totalorder %s4042_s23, 1  ;;  %p4044_p9 = scmp.ge.s32.totalorder %s4715_s21, 2 }
   0xc   : > { %p4794_p8 = por %p142_p7, %p141_p4  ;;  %187 = sbr.rel (%p4044_p9) target bundleno = 168 (0xa8), region = 20 }
  0x13   : > { %190 = sbr.rel (!%p56_p5) target bundleno = 168 (0xa8), region = 24  ;;  %s192_s30 = sand.u32 (%p56_p5), 1, %s4711_s20  }
  0x14   : > { %s4414_s6 = sshll.u32 (%p56_p5), %s4715_s21, 5  ;;  %s4544_s7 = smul.u32 (%p56_p5), 2304, %s192_s30 }
  0x15   : > { %s4806_s10 = scalar_lea.vmem (%p56_p5), %s5900_s1, %s4414_s6 }
  0x16   : > { %v210_v0 = vld [vmem:[%s4806_s10] sm:$0xff] (%p56_p5)  ;;  %v212_v1 = vld [vmem:[%s4806_s10 + $0x8] sm:$0xff] (%p56_p5)  ;;  %v214_v2 = vld [vmem:[%s4806_s10 + $0x10] sm:$0xff] (%p56_p5)  ;;  %s4814_s11 = scalar_lea.vmem (%p56_p5), [#allocation2], %s4544_s7 }
  0x17   : > { %v216_v3 = vld [vmem:[%s4806_s10 + $0x18] sm:$0xff] (%p56_p5)  ;;  %v218_v4 = vld [vmem:[%s4806_s10 + $0x40] sm:$0xff] (%p56_p5)  ;;  %v220_v5 = vld [vmem:[%s4806_s10 + $0x48] sm:$0xff] (%p56_p5)  ;;  %211 = vst [vmem:[%s4814_s11] sm:$0xff] (%p56_p5), %v210_v0 }
  0x18   : > { %213 = vst [vmem:[%s4814_s11 + $0x8] sm:$0xff] (%p56_p5), %v212_v1  ;;  %215 = vst [vmem:[%s4814_s11 + $0x10] sm:$0xff] (%p56_p5), %v214_v2  ;;  %v222_v6 = vld [vmem:[%s4806_s10 + $0x50] sm:$0xff] (%p56_p5)  ;;  %v224_v7 = vld [vmem:[%s4806_s10 + $0x58] sm:$0xff] (%p56_p5) }
  0x19   : > { %217 = vst [vmem:[%s4814_s11 + $0x18] sm:$0xff] (%p56_p5), %v216_v3  ;;  %219 = vst [vmem:[%s4814_s11 + $0x20] sm:$0xff] (%p56_p5), %v218_v4  ;;  %v226_v8 = vld [vmem:[%s4806_s10 + $0x80] sm:$0xff] (%p56_p5)  ;;  %v228_v9 = vld [vmem:[%s4806_s10 + $0x88] sm:$0xff] (%p56_p5) }
  0x1a   : > { %221 = vst [vmem:[%s4814_s11 + $0x28] sm:$0xff] %v220_v5  ;;  %223 = vst [vmem:[%s4814_s11 + $0x30] sm:$0xff] %v222_v6  ;;  %v230_v10 = vld [vmem:[%s4806_s10 + $0x90] sm:$0xff]  ;;  %v232_v11 = vld [vmem:[%s4806_s10 + $0x98] sm:$0xff] }
  0x1b   : > { %225 = vst [vmem:[%s4814_s11 + $0x38] sm:$0xff] %v224_v7  ;;  %227 = vst [vmem:[%s4814_s11 + $0x40] sm:$0xff] %v226_v8  ;;  %v234_v12 = vld [vmem:[%s4806_s10 + $0xc0] sm:$0xff]  ;;  %v236_v13 = vld [vmem:[%s4806_s10 + $0xc8] sm:$0xff] }
  0x1c   : > { %229 = vst [vmem:[%s4814_s11 + $0x48] sm:$0xff] %v228_v9  ;;  %231 = vst [vmem:[%s4814_s11 + $0x50] sm:$0xff] %v230_v10  ;;  %v238_v14 = vld [vmem:[%s4806_s10 + $0xd0] sm:$0xff]  ;;  %v240_v15 = vld [vmem:[%s4806_s10 + $0xd8] sm:$0xff] }
  0x1d   : > { %233 = vst [vmem:[%s4814_s11 + $0x58] sm:$0xff] %v232_v11  ;;  %235 = vst [vmem:[%s4814_s11 + $0x60] sm:$0xff] %v234_v12  ;;  %v242_v16 = vld [vmem:[%s4806_s10 + $0x100] sm:$0xff]  ;;  %v244_v17 = vld [vmem:[%s4806_s10 + $0x108] sm:$0xff] }
  0x1e   : > { %237 = vst [vmem:[%s4814_s11 + $0x68] sm:$0xff] %v236_v13  ;;  %239 = vst [vmem:[%s4814_s11 + $0x70] sm:$0xff] %v238_v14  ;;  %v246_v18 = vld [vmem:[%s4806_s10 + $0x110] sm:$0xff]  ;;  %v248_v19 = vld [vmem:[%s4806_s10 + $0x118] sm:$0xff] }
  0x1f   : > { %241 = vst [vmem:[%s4814_s11 + $0x78] sm:$0xff] %v240_v15  ;;  %243 = vst [vmem:[%s4814_s11 + $0x80] sm:$0xff] %v242_v16  ;;  %v250_v20 = vld [vmem:[%s4806_s10 + $0x140] sm:$0xff]  ;;  %v252_v21 = vld [vmem:[%s4806_s10 + $0x148] sm:$0xff] }
  0x20   : > { %245 = vst [vmem:[%s4814_s11 + $0x88] sm:$0xff] %v244_v17  ;;  %247 = vst [vmem:[%s4814_s11 + $0x90] sm:$0xff] %v246_v18  ;;  %v254_v22 = vld [vmem:[%s4806_s10 + $0x150] sm:$0xff]  ;;  %v256_v23 = vld [vmem:[%s4806_s10 + $0x158] sm:$0xff] }
  0x21   : > { %249 = vst [vmem:[%s4814_s11 + $0x98] sm:$0xff] %v248_v19  ;;  %251 = vst [vmem:[%s4814_s11 + $0xa0] sm:$0xff] %v250_v20  ;;  %v258_v24 = vld [vmem:[%s4806_s10 + $0x180] sm:$0xff]  ;;  %v260_v25 = vld [vmem:[%s4806_s10 + $0x188] sm:$0xff] }
  0x22   : > { %253 = vst [vmem:[%s4814_s11 + $0xa8] sm:$0xff] %v252_v21  ;;  %255 = vst [vmem:[%s4814_s11 + $0xb0] sm:$0xff] %v254_v22  ;;  %v262_v26 = vld [vmem:[%s4806_s10 + $0x190] sm:$0xff]  ;;  %v264_v27 = vld [vmem:[%s4806_s10 + $0x198] sm:$0xff] }
  0x23   : > { %257 = vst [vmem:[%s4814_s11 + $0xb8] sm:$0xff] %v256_v23  ;;  %259 = vst [vmem:[%s4814_s11 + $0xc0] sm:$0xff] %v258_v24  ;;  %v266_v28 = vld [vmem:[%s4806_s10 + $0x1c0] sm:$0xff]  ;;  %v268_v29 = vld [vmem:[%s4806_s10 + $0x1c8] sm:$0xff] }
  0x24   : > { %261 = vst [vmem:[%s4814_s11 + $0xc8] sm:$0xff] %v260_v25  ;;  %263 = vst [vmem:[%s4814_s11 + $0xd0] sm:$0xff] %v262_v26  ;;  %v270_v30 = vld [vmem:[%s4806_s10 + $0x1d0] sm:$0xff]  ;;  %v272_v31 = vld [vmem:[%s4806_s10 + $0x1d8] sm:$0xff] }
  0x25   : > { %265 = vst [vmem:[%s4814_s11 + $0xd8] sm:$0xff] %v264_v27  ;;  %267 = vst [vmem:[%s4814_s11 + $0xe0] sm:$0xff] %v266_v28  ;;  %v274_v32 = vld [vmem:[%s4806_s10 + $0x200] sm:$0xff]  ;;  %v276_v33 = vld [vmem:[%s4806_s10 + $0x208] sm:$0xff] }
  0x26   : > { %269 = vst [vmem:[%s4814_s11 + $0xe8] sm:$0xff] %v268_v29  ;;  %271 = vst [vmem:[%s4814_s11 + $0xf0] sm:$0xff] %v270_v30  ;;  %v278_v34 = vld [vmem:[%s4806_s10 + $0x210] sm:$0xff]  ;;  %v280_v35 = vld [vmem:[%s4806_s10 + $0x218] sm:$0xff] }
  0x27   : > { %273 = vst [vmem:[%s4814_s11 + $0xf8] sm:$0xff] %v272_v31  ;;  %275 = vst [vmem:[%s4814_s11 + $0x100] sm:$0xff] %v274_v32  ;;  %v282_v36 = vld [vmem:[%s4806_s10 + $0x240] sm:$0xff]  ;;  %v284_v37 = vld [vmem:[%s4806_s10 + $0x248] sm:$0xff] }
  0x28   : > { %277 = vst [vmem:[%s4814_s11 + $0x108] sm:$0xff] %v276_v33  ;;  %279 = vst [vmem:[%s4814_s11 + $0x110] sm:$0xff] %v278_v34  ;;  %v286_v38 = vld [vmem:[%s4806_s10 + $0x250] sm:$0xff]  ;;  %v288_v39 = vld [vmem:[%s4806_s10 + $0x258] sm:$0xff] }
  0x29   : > { %281 = vst [vmem:[%s4814_s11 + $0x118] sm:$0xff] %v280_v35  ;;  %283 = vst [vmem:[%s4814_s11 + $0x120] sm:$0xff] %v282_v36  ;;  %v290_v40 = vld [vmem:[%s4806_s10 + $0x280] sm:$0xff]  ;;  %v292_v41 = vld [vmem:[%s4806_s10 + $0x288] sm:$0xff] }
  0x2a   : > { %285 = vst [vmem:[%s4814_s11 + $0x128] sm:$0xff] %v284_v37  ;;  %287 = vst [vmem:[%s4814_s11 + $0x130] sm:$0xff] %v286_v38  ;;  %v294_v42 = vld [vmem:[%s4806_s10 + $0x290] sm:$0xff]  ;;  %v296_v43 = vld [vmem:[%s4806_s10 + $0x298] sm:$0xff] }
  0x2b   : > { %289 = vst [vmem:[%s4814_s11 + $0x138] sm:$0xff] %v288_v39  ;;  %291 = vst [vmem:[%s4814_s11 + $0x140] sm:$0xff] %v290_v40  ;;  %v298_v44 = vld [vmem:[%s4806_s10 + $0x2c0] sm:$0xff]  ;;  %v300_v45 = vld [vmem:[%s4806_s10 + $0x2c8] sm:$0xff] }
  0x2c   : > { %293 = vst [vmem:[%s4814_s11 + $0x148] sm:$0xff] %v292_v41  ;;  %295 = vst [vmem:[%s4814_s11 + $0x150] sm:$0xff] %v294_v42  ;;  %v302_v46 = vld [vmem:[%s4806_s10 + $0x2d0] sm:$0xff]  ;;  %v304_v47 = vld [vmem:[%s4806_s10 + $0x2d8] sm:$0xff] }
  0x2d   : > { %297 = vst [vmem:[%s4814_s11 + $0x158] sm:$0xff] %v296_v43  ;;  %299 = vst [vmem:[%s4814_s11 + $0x160] sm:$0xff] %v298_v44  ;;  %v306_v48 = vld [vmem:[%s4806_s10 + $0x300] sm:$0xff]  ;;  %v308_v49 = vld [vmem:[%s4806_s10 + $0x308] sm:$0xff] }
  0x2e   : > { %301 = vst [vmem:[%s4814_s11 + $0x168] sm:$0xff] %v300_v45  ;;  %303 = vst [vmem:[%s4814_s11 + $0x170] sm:$0xff] %v302_v46  ;;  %v310_v50 = vld [vmem:[%s4806_s10 + $0x310] sm:$0xff]  ;;  %v312_v51 = vld [vmem:[%s4806_s10 + $0x318] sm:$0xff] }
  0x2f   : > { %305 = vst [vmem:[%s4814_s11 + $0x178] sm:$0xff] %v304_v47  ;;  %307 = vst [vmem:[%s4814_s11 + $0x180] sm:$0xff] %v306_v48  ;;  %v314_v52 = vld [vmem:[%s4806_s10 + $0x340] sm:$0xff]  ;;  %v316_v53 = vld [vmem:[%s4806_s10 + $0x348] sm:$0xff] }
  0x30   : > { %309 = vst [vmem:[%s4814_s11 + $0x188] sm:$0xff] %v308_v49  ;;  %311 = vst [vmem:[%s4814_s11 + $0x190] sm:$0xff] %v310_v50  ;;  %v318_v54 = vld [vmem:[%s4806_s10 + $0x350] sm:$0xff]  ;;  %v320_v55 = vld [vmem:[%s4806_s10 + $0x358] sm:$0xff] }
  0x31   : > { %313 = vst [vmem:[%s4814_s11 + $0x198] sm:$0xff] %v312_v51  ;;  %315 = vst [vmem:[%s4814_s11 + $0x1a0] sm:$0xff] %v314_v52  ;;  %v322_v56 = vld [vmem:[%s4806_s10 + $0x380] sm:$0xff]  ;;  %v324_v57 = vld [vmem:[%s4806_s10 + $0x388] sm:$0xff] }
  0x32   : > { %317 = vst [vmem:[%s4814_s11 + $0x1a8] sm:$0xff] %v316_v53  ;;  %319 = vst [vmem:[%s4814_s11 + $0x1b0] sm:$0xff] %v318_v54  ;;  %v326_v58 = vld [vmem:[%s4806_s10 + $0x390] sm:$0xff]  ;;  %v328_v59 = vld [vmem:[%s4806_s10 + $0x398] sm:$0xff] }
  0x33   : > { %321 = vst [vmem:[%s4814_s11 + $0x1b8] sm:$0xff] %v320_v55  ;;  %323 = vst [vmem:[%s4814_s11 + $0x1c0] sm:$0xff] %v322_v56  ;;  %v330_v60 = vld [vmem:[%s4806_s10 + $0x3c0] sm:$0xff]  ;;  %v332_v61 = vld [vmem:[%s4806_s10 + $0x3c8] sm:$0xff] }
  0x34   : > { %325 = vst [vmem:[%s4814_s11 + $0x1c8] sm:$0xff] %v324_v57  ;;  %327 = vst [vmem:[%s4814_s11 + $0x1d0] sm:$0xff] %v326_v58  ;;  %v334_v62 = vld [vmem:[%s4806_s10 + $0x3d0] sm:$0xff]  ;;  %v336_v63 = vld [vmem:[%s4806_s10 + $0x3d8] sm:$0xff] }
  0x35   : > { %329 = vst [vmem:[%s4814_s11 + $0x1d8] sm:$0xff] %v328_v59  ;;  %331 = vst [vmem:[%s4814_s11 + $0x1e0] sm:$0xff] %v330_v60  ;;  %v338_v0 = vld [vmem:[%s4806_s10 + $0x400] sm:$0xff]  ;;  %v340_v1 = vld [vmem:[%s4806_s10 + $0x408] sm:$0xff] }
  0x36   : > { %333 = vst [vmem:[%s4814_s11 + $0x1e8] sm:$0xff] %v332_v61  ;;  %335 = vst [vmem:[%s4814_s11 + $0x1f0] sm:$0xff] %v334_v62  ;;  %v342_v2 = vld [vmem:[%s4806_s10 + $0x410] sm:$0xff]  ;;  %v344_v3 = vld [vmem:[%s4806_s10 + $0x418] sm:$0xff] }
  0x37   : > { %337 = vst [vmem:[%s4814_s11 + $0x1f8] sm:$0xff] %v336_v63  ;;  %339 = vst [vmem:[%s4814_s11 + $0x200] sm:$0xff] %v338_v0  ;;  %v346_v4 = vld [vmem:[%s4806_s10 + $0x440] sm:$0xff]  ;;  %v348_v5 = vld [vmem:[%s4806_s10 + $0x448] sm:$0xff] }
  0x38   : > { %341 = vst [vmem:[%s4814_s11 + $0x208] sm:$0xff] %v340_v1  ;;  %343 = vst [vmem:[%s4814_s11 + $0x210] sm:$0xff] %v342_v2  ;;  %v350_v6 = vld [vmem:[%s4806_s10 + $0x450] sm:$0xff]  ;;  %v352_v7 = vld [vmem:[%s4806_s10 + $0x458] sm:$0xff] }
  0x39   : > { %345 = vst [vmem:[%s4814_s11 + $0x218] sm:$0xff] %v344_v3  ;;  %347 = vst [vmem:[%s4814_s11 + $0x220] sm:$0xff] %v346_v4  ;;  %v354_v8 = vld [vmem:[%s4806_s10 + $0x480] sm:$0xff]  ;;  %v356_v9 = vld [vmem:[%s4806_s10 + $0x488] sm:$0xff] }
  0x3a   : > { %349 = vst [vmem:[%s4814_s11 + $0x228] sm:$0xff] %v348_v5  ;;  %351 = vst [vmem:[%s4814_s11 + $0x230] sm:$0xff] %v350_v6  ;;  %v358_v10 = vld [vmem:[%s4806_s10 + $0x490] sm:$0xff]  ;;  %v360_v11 = vld [vmem:[%s4806_s10 + $0x498] sm:$0xff] }
  0x3b   : > { %353 = vst [vmem:[%s4814_s11 + $0x238] sm:$0xff] %v352_v7  ;;  %355 = vst [vmem:[%s4814_s11 + $0x240] sm:$0xff] %v354_v8  ;;  %v362_v12 = vld [vmem:[%s4806_s10 + $0x4c0] sm:$0xff]  ;;  %v364_v13 = vld [vmem:[%s4806_s10 + $0x4c8] sm:$0xff] }
  0x3c   : > { %357 = vst [vmem:[%s4814_s11 + $0x248] sm:$0xff] %v356_v9  ;;  %359 = vst [vmem:[%s4814_s11 + $0x250] sm:$0xff] %v358_v10  ;;  %v366_v14 = vld [vmem:[%s4806_s10 + $0x4d0] sm:$0xff]  ;;  %v368_v15 = vld [vmem:[%s4806_s10 + $0x4d8] sm:$0xff] }
  0x3d   : > { %361 = vst [vmem:[%s4814_s11 + $0x258] sm:$0xff] %v360_v11  ;;  %363 = vst [vmem:[%s4814_s11 + $0x260] sm:$0xff] %v362_v12  ;;  %v370_v16 = vld [vmem:[%s4806_s10 + $0x500] sm:$0xff]  ;;  %v372_v17 = vld [vmem:[%s4806_s10 + $0x508] sm:$0xff] }
  0x3e   : > { %365 = vst [vmem:[%s4814_s11 + $0x268] sm:$0xff] %v364_v13  ;;  %367 = vst [vmem:[%s4814_s11 + $0x270] sm:$0xff] %v366_v14  ;;  %v374_v18 = vld [vmem:[%s4806_s10 + $0x510] sm:$0xff]  ;;  %v376_v19 = vld [vmem:[%s4806_s10 + $0x518] sm:$0xff] }
  0x3f   : > { %369 = vst [vmem:[%s4814_s11 + $0x278] sm:$0xff] %v368_v15  ;;  %371 = vst [vmem:[%s4814_s11 + $0x280] sm:$0xff] %v370_v16  ;;  %v378_v20 = vld [vmem:[%s4806_s10 + $0x540] sm:$0xff]  ;;  %v380_v21 = vld [vmem:[%s4806_s10 + $0x548] sm:$0xff] }
  0x40   : > { %373 = vst [vmem:[%s4814_s11 + $0x288] sm:$0xff] %v372_v17  ;;  %375 = vst [vmem:[%s4814_s11 + $0x290] sm:$0xff] %v374_v18  ;;  %v382_v22 = vld [vmem:[%s4806_s10 + $0x550] sm:$0xff]  ;;  %v384_v23 = vld [vmem:[%s4806_s10 + $0x558] sm:$0xff] }
  0x41   : > { %377 = vst [vmem:[%s4814_s11 + $0x298] sm:$0xff] %v376_v19  ;;  %379 = vst [vmem:[%s4814_s11 + $0x2a0] sm:$0xff] %v378_v20  ;;  %v386_v24 = vld [vmem:[%s4806_s10 + $0x580] sm:$0xff]  ;;  %v388_v25 = vld [vmem:[%s4806_s10 + $0x588] sm:$0xff] }
  0x42   : > { %381 = vst [vmem:[%s4814_s11 + $0x2a8] sm:$0xff] %v380_v21  ;;  %383 = vst [vmem:[%s4814_s11 + $0x2b0] sm:$0xff] %v382_v22  ;;  %v390_v26 = vld [vmem:[%s4806_s10 + $0x590] sm:$0xff]  ;;  %v392_v27 = vld [vmem:[%s4806_s10 + $0x598] sm:$0xff] }
  0x43   : > { %385 = vst [vmem:[%s4814_s11 + $0x2b8] sm:$0xff] %v384_v23  ;;  %387 = vst [vmem:[%s4814_s11 + $0x2c0] sm:$0xff] %v386_v24  ;;  %v394_v28 = vld [vmem:[%s4806_s10 + $0x5c0] sm:$0xff]  ;;  %v396_v29 = vld [vmem:[%s4806_s10 + $0x5c8] sm:$0xff] }
  0x44   : > { %389 = vst [vmem:[%s4814_s11 + $0x2c8] sm:$0xff] %v388_v25  ;;  %391 = vst [vmem:[%s4814_s11 + $0x2d0] sm:$0xff] %v390_v26  ;;  %v398_v30 = vld [vmem:[%s4806_s10 + $0x5d0] sm:$0xff]  ;;  %v400_v31 = vld [vmem:[%s4806_s10 + $0x5d8] sm:$0xff] }
  0x45   : > { %393 = vst [vmem:[%s4814_s11 + $0x2d8] sm:$0xff] %v392_v27  ;;  %395 = vst [vmem:[%s4814_s11 + $0x2e0] sm:$0xff] %v394_v28  ;;  %v402_v32 = vld [vmem:[%s4806_s10 + $0x600] sm:$0xff]  ;;  %v404_v33 = vld [vmem:[%s4806_s10 + $0x608] sm:$0xff] }
  0x46   : > { %397 = vst [vmem:[%s4814_s11 + $0x2e8] sm:$0xff] %v396_v29  ;;  %399 = vst [vmem:[%s4814_s11 + $0x2f0] sm:$0xff] %v398_v30  ;;  %v406_v34 = vld [vmem:[%s4806_s10 + $0x610] sm:$0xff]  ;;  %v408_v35 = vld [vmem:[%s4806_s10 + $0x618] sm:$0xff] }
  0x47   : > { %401 = vst [vmem:[%s4814_s11 + $0x2f8] sm:$0xff] %v400_v31  ;;  %403 = vst [vmem:[%s4814_s11 + $0x300] sm:$0xff] %v402_v32  ;;  %v410_v36 = vld [vmem:[%s4806_s10 + $0x640] sm:$0xff]  ;;  %v412_v37 = vld [vmem:[%s4806_s10 + $0x648] sm:$0xff] }
  0x48   : > { %405 = vst [vmem:[%s4814_s11 + $0x308] sm:$0xff] %v404_v33  ;;  %407 = vst [vmem:[%s4814_s11 + $0x310] sm:$0xff] %v406_v34  ;;  %v414_v38 = vld [vmem:[%s4806_s10 + $0x650] sm:$0xff]  ;;  %v416_v39 = vld [vmem:[%s4806_s10 + $0x658] sm:$0xff] }
  0x49   : > { %409 = vst [vmem:[%s4814_s11 + $0x318] sm:$0xff] %v408_v35  ;;  %411 = vst [vmem:[%s4814_s11 + $0x320] sm:$0xff] %v410_v36  ;;  %v418_v40 = vld [vmem:[%s4806_s10 + $0x680] sm:$0xff]  ;;  %v420_v41 = vld [vmem:[%s4806_s10 + $0x688] sm:$0xff] }
  0x4a   : > { %413 = vst [vmem:[%s4814_s11 + $0x328] sm:$0xff] %v412_v37  ;;  %415 = vst [vmem:[%s4814_s11 + $0x330] sm:$0xff] %v414_v38  ;;  %v422_v42 = vld [vmem:[%s4806_s10 + $0x690] sm:$0xff]  ;;  %v424_v43 = vld [vmem:[%s4806_s10 + $0x698] sm:$0xff] }
  0x4b   : > { %417 = vst [vmem:[%s4814_s11 + $0x338] sm:$0xff] %v416_v39  ;;  %419 = vst [vmem:[%s4814_s11 + $0x340] sm:$0xff] %v418_v40  ;;  %v426_v44 = vld [vmem:[%s4806_s10 + $0x6c0] sm:$0xff]  ;;  %v428_v45 = vld [vmem:[%s4806_s10 + $0x6c8] sm:$0xff] }
  0x4c   : > { %421 = vst [vmem:[%s4814_s11 + $0x348] sm:$0xff] %v420_v41  ;;  %423 = vst [vmem:[%s4814_s11 + $0x350] sm:$0xff] %v422_v42  ;;  %v430_v46 = vld [vmem:[%s4806_s10 + $0x6d0] sm:$0xff]  ;;  %v432_v47 = vld [vmem:[%s4806_s10 + $0x6d8] sm:$0xff] }
  0x4d   : > { %425 = vst [vmem:[%s4814_s11 + $0x358] sm:$0xff] %v424_v43  ;;  %427 = vst [vmem:[%s4814_s11 + $0x360] sm:$0xff] %v426_v44  ;;  %v434_v48 = vld [vmem:[%s4806_s10 + $0x700] sm:$0xff]  ;;  %v436_v49 = vld [vmem:[%s4806_s10 + $0x708] sm:$0xff] }
  0x4e   : > { %429 = vst [vmem:[%s4814_s11 + $0x368] sm:$0xff] %v428_v45  ;;  %431 = vst [vmem:[%s4814_s11 + $0x370] sm:$0xff] %v430_v46  ;;  %v438_v50 = vld [vmem:[%s4806_s10 + $0x710] sm:$0xff]  ;;  %v440_v51 = vld [vmem:[%s4806_s10 + $0x718] sm:$0xff] }
  0x4f   : > { %433 = vst [vmem:[%s4814_s11 + $0x378] sm:$0xff] %v432_v47  ;;  %435 = vst [vmem:[%s4814_s11 + $0x380] sm:$0xff] %v434_v48  ;;  %v442_v52 = vld [vmem:[%s4806_s10 + $0x740] sm:$0xff]  ;;  %v444_v53 = vld [vmem:[%s4806_s10 + $0x748] sm:$0xff] }
  0x50   : > { %437 = vst [vmem:[%s4814_s11 + $0x388] sm:$0xff] %v436_v49  ;;  %439 = vst [vmem:[%s4814_s11 + $0x390] sm:$0xff] %v438_v50  ;;  %v446_v54 = vld [vmem:[%s4806_s10 + $0x750] sm:$0xff]  ;;  %v448_v55 = vld [vmem:[%s4806_s10 + $0x758] sm:$0xff] }
  0x51   : > { %441 = vst [vmem:[%s4814_s11 + $0x398] sm:$0xff] %v440_v51  ;;  %443 = vst [vmem:[%s4814_s11 + $0x3a0] sm:$0xff] %v442_v52  ;;  %v450_v56 = vld [vmem:[%s4806_s10 + $0x780] sm:$0xff]  ;;  %v452_v57 = vld [vmem:[%s4806_s10 + $0x788] sm:$0xff] }
  0x52   : > { %445 = vst [vmem:[%s4814_s11 + $0x3a8] sm:$0xff] %v444_v53  ;;  %447 = vst [vmem:[%s4814_s11 + $0x3b0] sm:$0xff] %v446_v54  ;;  %v454_v58 = vld [vmem:[%s4806_s10 + $0x790] sm:$0xff]  ;;  %v456_v59 = vld [vmem:[%s4806_s10 + $0x798] sm:$0xff] }
  0x53   : > { %449 = vst [vmem:[%s4814_s11 + $0x3b8] sm:$0xff] %v448_v55  ;;  %451 = vst [vmem:[%s4814_s11 + $0x3c0] sm:$0xff] %v450_v56  ;;  %v458_v60 = vld [vmem:[%s4806_s10 + $0x7c0] sm:$0xff]  ;;  %v460_v61 = vld [vmem:[%s4806_s10 + $0x7c8] sm:$0xff] }
  0x54   : > { %453 = vst [vmem:[%s4814_s11 + $0x3c8] sm:$0xff] %v452_v57  ;;  %455 = vst [vmem:[%s4814_s11 + $0x3d0] sm:$0xff] %v454_v58  ;;  %v462_v62 = vld [vmem:[%s4806_s10 + $0x7d0] sm:$0xff]  ;;  %v464_v63 = vld [vmem:[%s4806_s10 + $0x7d8] sm:$0xff] }
  0x55   : > { %457 = vst [vmem:[%s4814_s11 + $0x3d8] sm:$0xff] %v456_v59  ;;  %459 = vst [vmem:[%s4814_s11 + $0x3e0] sm:$0xff] %v458_v60  ;;  %v466_v0 = vld [vmem:[%s4806_s10 + $0x800] sm:$0xff]  ;;  %v468_v1 = vld [vmem:[%s4806_s10 + $0x808] sm:$0xff] }
  0x56   : > { %461 = vst [vmem:[%s4814_s11 + $0x3e8] sm:$0xff] %v460_v61  ;;  %463 = vst [vmem:[%s4814_s11 + $0x3f0] sm:$0xff] %v462_v62  ;;  %v470_v2 = vld [vmem:[%s4806_s10 + $0x810] sm:$0xff]  ;;  %v472_v3 = vld [vmem:[%s4806_s10 + $0x818] sm:$0xff] }
  0x57   : > { %465 = vst [vmem:[%s4814_s11 + $0x3f8] sm:$0xff] %v464_v63  ;;  %467 = vst [vmem:[%s4814_s11 + $0x400] sm:$0xff] %v466_v0  ;;  %v474_v4 = vld [vmem:[%s4806_s10 + $0x840] sm:$0xff]  ;;  %v476_v5 = vld [vmem:[%s4806_s10 + $0x848] sm:$0xff] }
  0x58   : > { %469 = vst [vmem:[%s4814_s11 + $0x408] sm:$0xff] %v468_v1  ;;  %471 = vst [vmem:[%s4814_s11 + $0x410] sm:$0xff] %v470_v2  ;;  %v478_v6 = vld [vmem:[%s4806_s10 + $0x850] sm:$0xff]  ;;  %v480_v7 = vld [vmem:[%s4806_s10 + $0x858] sm:$0xff] }
  0x59   : > { %473 = vst [vmem:[%s4814_s11 + $0x418] sm:$0xff] %v472_v3  ;;  %475 = vst [vmem:[%s4814_s11 + $0x420] sm:$0xff] %v474_v4  ;;  %v482_v8 = vld [vmem:[%s4806_s10 + $0x880] sm:$0xff]  ;;  %v484_v9 = vld [vmem:[%s4806_s10 + $0x888] sm:$0xff] }
  0x5a   : > { %477 = vst [vmem:[%s4814_s11 + $0x428] sm:$0xff] %v476_v5  ;;  %479 = vst [vmem:[%s4814_s11 + $0x430] sm:$0xff] %v478_v6  ;;  %v486_v10 = vld [vmem:[%s4806_s10 + $0x890] sm:$0xff]  ;;  %v488_v11 = vld [vmem:[%s4806_s10 + $0x898] sm:$0xff] }
  0x5b   : > { %481 = vst [vmem:[%s4814_s11 + $0x438] sm:$0xff] %v480_v7  ;;  %483 = vst [vmem:[%s4814_s11 + $0x440] sm:$0xff] %v482_v8  ;;  %v490_v12 = vld [vmem:[%s4806_s10 + $0x8c0] sm:$0xff]  ;;  %v492_v13 = vld [vmem:[%s4806_s10 + $0x8c8] sm:$0xff] }
  0x5c   : > { %485 = vst [vmem:[%s4814_s11 + $0x448] sm:$0xff] %v484_v9  ;;  %487 = vst [vmem:[%s4814_s11 + $0x450] sm:$0xff] %v486_v10  ;;  %v494_v14 = vld [vmem:[%s4806_s10 + $0x8d0] sm:$0xff]  ;;  %v496_v15 = vld [vmem:[%s4806_s10 + $0x8d8] sm:$0xff] }
  0x5d   : > { %489 = vst [vmem:[%s4814_s11 + $0x458] sm:$0xff] %v488_v11  ;;  %491 = vst [vmem:[%s4814_s11 + $0x460] sm:$0xff] %v490_v12  ;;  %v498_v16 = vld [vmem:[%s4806_s10 + $0x900] sm:$0xff]  ;;  %v500_v17 = vld [vmem:[%s4806_s10 + $0x908] sm:$0xff] }
  0x5e   : > { %493 = vst [vmem:[%s4814_s11 + $0x468] sm:$0xff] %v492_v13  ;;  %495 = vst [vmem:[%s4814_s11 + $0x470] sm:$0xff] %v494_v14  ;;  %v502_v18 = vld [vmem:[%s4806_s10 + $0x910] sm:$0xff]  ;;  %v504_v19 = vld [vmem:[%s4806_s10 + $0x918] sm:$0xff] }
  0x5f   : > { %497 = vst [vmem:[%s4814_s11 + $0x478] sm:$0xff] %v496_v15  ;;  %499 = vst [vmem:[%s4814_s11 + $0x480] sm:$0xff] %v498_v16  ;;  %v506_v20 = vld [vmem:[%s4806_s10 + $0x940] sm:$0xff]  ;;  %v508_v21 = vld [vmem:[%s4806_s10 + $0x948] sm:$0xff] }
  0x60   : > { %501 = vst [vmem:[%s4814_s11 + $0x488] sm:$0xff] %v500_v17  ;;  %503 = vst [vmem:[%s4814_s11 + $0x490] sm:$0xff] %v502_v18  ;;  %v510_v22 = vld [vmem:[%s4806_s10 + $0x950] sm:$0xff]  ;;  %v512_v23 = vld [vmem:[%s4806_s10 + $0x958] sm:$0xff] }
  0x61   : > { %505 = vst [vmem:[%s4814_s11 + $0x498] sm:$0xff] %v504_v19  ;;  %507 = vst [vmem:[%s4814_s11 + $0x4a0] sm:$0xff] %v506_v20  ;;  %v514_v24 = vld [vmem:[%s4806_s10 + $0x980] sm:$0xff]  ;;  %v516_v25 = vld [vmem:[%s4806_s10 + $0x988] sm:$0xff] }
  0x62   : > { %509 = vst [vmem:[%s4814_s11 + $0x4a8] sm:$0xff] %v508_v21  ;;  %511 = vst [vmem:[%s4814_s11 + $0x4b0] sm:$0xff] %v510_v22  ;;  %v518_v26 = vld [vmem:[%s4806_s10 + $0x990] sm:$0xff]  ;;  %v520_v27 = vld [vmem:[%s4806_s10 + $0x998] sm:$0xff] }
  0x63   : > { %513 = vst [vmem:[%s4814_s11 + $0x4b8] sm:$0xff] %v512_v23  ;;  %515 = vst [vmem:[%s4814_s11 + $0x4c0] sm:$0xff] %v514_v24  ;;  %v522_v28 = vld [vmem:[%s4806_s10 + $0x9c0] sm:$0xff]  ;;  %v524_v29 = vld [vmem:[%s4806_s10 + $0x9c8] sm:$0xff] }
  0x64   : > { %517 = vst [vmem:[%s4814_s11 + $0x4c8] sm:$0xff] %v516_v25  ;;  %519 = vst [vmem:[%s4814_s11 + $0x4d0] sm:$0xff] %v518_v26  ;;  %v526_v30 = vld [vmem:[%s4806_s10 + $0x9d0] sm:$0xff]  ;;  %v528_v31 = vld [vmem:[%s4806_s10 + $0x9d8] sm:$0xff] }
  0x65   : > { %521 = vst [vmem:[%s4814_s11 + $0x4d8] sm:$0xff] %v520_v27  ;;  %523 = vst [vmem:[%s4814_s11 + $0x4e0] sm:$0xff] %v522_v28  ;;  %v530_v32 = vld [vmem:[%s4806_s10 + $0xa00] sm:$0xff]  ;;  %v532_v33 = vld [vmem:[%s4806_s10 + $0xa08] sm:$0xff] }
  0x66   : > { %525 = vst [vmem:[%s4814_s11 + $0x4e8] sm:$0xff] %v524_v29  ;;  %527 = vst [vmem:[%s4814_s11 + $0x4f0] sm:$0xff] %v526_v30  ;;  %v534_v34 = vld [vmem:[%s4806_s10 + $0xa10] sm:$0xff]  ;;  %v536_v35 = vld [vmem:[%s4806_s10 + $0xa18] sm:$0xff] }
  0x67   : > { %529 = vst [vmem:[%s4814_s11 + $0x4f8] sm:$0xff] %v528_v31  ;;  %531 = vst [vmem:[%s4814_s11 + $0x500] sm:$0xff] %v530_v32  ;;  %v538_v36 = vld [vmem:[%s4806_s10 + $0xa40] sm:$0xff]  ;;  %v540_v37 = vld [vmem:[%s4806_s10 + $0xa48] sm:$0xff] }
  0x68   : > { %533 = vst [vmem:[%s4814_s11 + $0x508] sm:$0xff] %v532_v33  ;;  %535 = vst [vmem:[%s4814_s11 + $0x510] sm:$0xff] %v534_v34  ;;  %v542_v38 = vld [vmem:[%s4806_s10 + $0xa50] sm:$0xff]  ;;  %v544_v39 = vld [vmem:[%s4806_s10 + $0xa58] sm:$0xff] }
  0x69   : > { %537 = vst [vmem:[%s4814_s11 + $0x518] sm:$0xff] %v536_v35  ;;  %539 = vst [vmem:[%s4814_s11 + $0x520] sm:$0xff] %v538_v36  ;;  %v546_v40 = vld [vmem:[%s4806_s10 + $0xa80] sm:$0xff]  ;;  %v548_v41 = vld [vmem:[%s4806_s10 + $0xa88] sm:$0xff] }
  0x6a   : > { %541 = vst [vmem:[%s4814_s11 + $0x528] sm:$0xff] %v540_v37  ;;  %543 = vst [vmem:[%s4814_s11 + $0x530] sm:$0xff] %v542_v38  ;;  %v550_v42 = vld [vmem:[%s4806_s10 + $0xa90] sm:$0xff]  ;;  %v552_v43 = vld [vmem:[%s4806_s10 + $0xa98] sm:$0xff] }
  0x6b   : > { %545 = vst [vmem:[%s4814_s11 + $0x538] sm:$0xff] %v544_v39  ;;  %547 = vst [vmem:[%s4814_s11 + $0x540] sm:$0xff] %v546_v40  ;;  %v554_v44 = vld [vmem:[%s4806_s10 + $0xac0] sm:$0xff]  ;;  %v556_v45 = vld [vmem:[%s4806_s10 + $0xac8] sm:$0xff] }
  0x6c   : > { %549 = vst [vmem:[%s4814_s11 + $0x548] sm:$0xff] %v548_v41  ;;  %551 = vst [vmem:[%s4814_s11 + $0x550] sm:$0xff] %v550_v42  ;;  %v558_v46 = vld [vmem:[%s4806_s10 + $0xad0] sm:$0xff]  ;;  %v560_v47 = vld [vmem:[%s4806_s10 + $0xad8] sm:$0xff] }
  0x6d   : > { %553 = vst [vmem:[%s4814_s11 + $0x558] sm:$0xff] %v552_v43  ;;  %555 = vst [vmem:[%s4814_s11 + $0x560] sm:$0xff] %v554_v44  ;;  %v562_v48 = vld [vmem:[%s4806_s10 + $0xb00] sm:$0xff]  ;;  %v564_v49 = vld [vmem:[%s4806_s10 + $0xb08] sm:$0xff] }
  0x6e   : > { %557 = vst [vmem:[%s4814_s11 + $0x568] sm:$0xff] %v556_v45  ;;  %559 = vst [vmem:[%s4814_s11 + $0x570] sm:$0xff] %v558_v46  ;;  %v566_v50 = vld [vmem:[%s4806_s10 + $0xb10] sm:$0xff]  ;;  %v568_v51 = vld [vmem:[%s4806_s10 + $0xb18] sm:$0xff] }
  0x6f   : > { %561 = vst [vmem:[%s4814_s11 + $0x578] sm:$0xff] %v560_v47  ;;  %563 = vst [vmem:[%s4814_s11 + $0x580] sm:$0xff] %v562_v48  ;;  %v570_v52 = vld [vmem:[%s4806_s10 + $0xb40] sm:$0xff]  ;;  %v572_v53 = vld [vmem:[%s4806_s10 + $0xb48] sm:$0xff] }
  0x70   : > { %565 = vst [vmem:[%s4814_s11 + $0x588] sm:$0xff] %v564_v49  ;;  %567 = vst [vmem:[%s4814_s11 + $0x590] sm:$0xff] %v566_v50  ;;  %v574_v54 = vld [vmem:[%s4806_s10 + $0xb50] sm:$0xff]  ;;  %v576_v55 = vld [vmem:[%s4806_s10 + $0xb58] sm:$0xff] }
  0x71   : > { %569 = vst [vmem:[%s4814_s11 + $0x598] sm:$0xff] %v568_v51  ;;  %571 = vst [vmem:[%s4814_s11 + $0x5a0] sm:$0xff] %v570_v52  ;;  %v578_v56 = vld [vmem:[%s4806_s10 + $0xb80] sm:$0xff]  ;;  %v580_v57 = vld [vmem:[%s4806_s10 + $0xb88] sm:$0xff] }
  0x72   : > { %573 = vst [vmem:[%s4814_s11 + $0x5a8] sm:$0xff] %v572_v53  ;;  %575 = vst [vmem:[%s4814_s11 + $0x5b0] sm:$0xff] %v574_v54  ;;  %v582_v58 = vld [vmem:[%s4806_s10 + $0xb90] sm:$0xff]  ;;  %v584_v59 = vld [vmem:[%s4806_s10 + $0xb98] sm:$0xff] }
  0x73   : > { %577 = vst [vmem:[%s4814_s11 + $0x5b8] sm:$0xff] %v576_v55  ;;  %579 = vst [vmem:[%s4814_s11 + $0x5c0] sm:$0xff] %v578_v56  ;;  %v586_v60 = vld [vmem:[%s4806_s10 + $0xbc0] sm:$0xff]  ;;  %v588_v61 = vld [vmem:[%s4806_s10 + $0xbc8] sm:$0xff] }
  0x74   : > { %581 = vst [vmem:[%s4814_s11 + $0x5c8] sm:$0xff] %v580_v57  ;;  %583 = vst [vmem:[%s4814_s11 + $0x5d0] sm:$0xff] %v582_v58  ;;  %v590_v62 = vld [vmem:[%s4806_s10 + $0xbd0] sm:$0xff]  ;;  %v592_v63 = vld [vmem:[%s4806_s10 + $0xbd8] sm:$0xff] }
  0x75   : > { %585 = vst [vmem:[%s4814_s11 + $0x5d8] sm:$0xff] %v584_v59  ;;  %587 = vst [vmem:[%s4814_s11 + $0x5e0] sm:$0xff] %v586_v60  ;;  %v594_v0 = vld [vmem:[%s4806_s10 + $0xc00] sm:$0xff]  ;;  %v596_v1 = vld [vmem:[%s4806_s10 + $0xc08] sm:$0xff] }
  0x76   : > { %589 = vst [vmem:[%s4814_s11 + $0x5e8] sm:$0xff] %v588_v61  ;;  %591 = vst [vmem:[%s4814_s11 + $0x5f0] sm:$0xff] %v590_v62  ;;  %v598_v2 = vld [vmem:[%s4806_s10 + $0xc10] sm:$0xff]  ;;  %v600_v3 = vld [vmem:[%s4806_s10 + $0xc18] sm:$0xff] }
  0x77   : > { %593 = vst [vmem:[%s4814_s11 + $0x5f8] sm:$0xff] %v592_v63  ;;  %595 = vst [vmem:[%s4814_s11 + $0x600] sm:$0xff] %v594_v0  ;;  %v602_v4 = vld [vmem:[%s4806_s10 + $0xc40] sm:$0xff]  ;;  %v604_v5 = vld [vmem:[%s4806_s10 + $0xc48] sm:$0xff] }
  0x78   : > { %597 = vst [vmem:[%s4814_s11 + $0x608] sm:$0xff] %v596_v1  ;;  %599 = vst [vmem:[%s4814_s11 + $0x610] sm:$0xff] %v598_v2  ;;  %v606_v6 = vld [vmem:[%s4806_s10 + $0xc50] sm:$0xff]  ;;  %v608_v7 = vld [vmem:[%s4806_s10 + $0xc58] sm:$0xff] }
  0x79   : > { %601 = vst [vmem:[%s4814_s11 + $0x618] sm:$0xff] %v600_v3  ;;  %603 = vst [vmem:[%s4814_s11 + $0x620] sm:$0xff] %v602_v4  ;;  %v610_v8 = vld [vmem:[%s4806_s10 + $0xc80] sm:$0xff]  ;;  %v612_v9 = vld [vmem:[%s4806_s10 + $0xc88] sm:$0xff] }
  0x7a   : > { %605 = vst [vmem:[%s4814_s11 + $0x628] sm:$0xff] %v604_v5  ;;  %607 = vst [vmem:[%s4814_s11 + $0x630] sm:$0xff] %v606_v6  ;;  %v614_v10 = vld [vmem:[%s4806_s10 + $0xc90] sm:$0xff]  ;;  %v616_v11 = vld [vmem:[%s4806_s10 + $0xc98] sm:$0xff] }
  0x7b   : > { %609 = vst [vmem:[%s4814_s11 + $0x638] sm:$0xff] %v608_v7  ;;  %611 = vst [vmem:[%s4814_s11 + $0x640] sm:$0xff] %v610_v8  ;;  %v618_v12 = vld [vmem:[%s4806_s10 + $0xcc0] sm:$0xff]  ;;  %v620_v13 = vld [vmem:[%s4806_s10 + $0xcc8] sm:$0xff] }
  0x7c   : > { %613 = vst [vmem:[%s4814_s11 + $0x648] sm:$0xff] %v612_v9  ;;  %615 = vst [vmem:[%s4814_s11 + $0x650] sm:$0xff] %v614_v10  ;;  %v622_v14 = vld [vmem:[%s4806_s10 + $0xcd0] sm:$0xff]  ;;  %v624_v15 = vld [vmem:[%s4806_s10 + $0xcd8] sm:$0xff] }
  0x7d   : > { %617 = vst [vmem:[%s4814_s11 + $0x658] sm:$0xff] %v616_v11  ;;  %619 = vst [vmem:[%s4814_s11 + $0x660] sm:$0xff] %v618_v12  ;;  %v626_v16 = vld [vmem:[%s4806_s10 + $0xd00] sm:$0xff]  ;;  %v628_v17 = vld [vmem:[%s4806_s10 + $0xd08] sm:$0xff] }
  0x7e   : > { %621 = vst [vmem:[%s4814_s11 + $0x668] sm:$0xff] %v620_v13  ;;  %623 = vst [vmem:[%s4814_s11 + $0x670] sm:$0xff] %v622_v14  ;;  %v630_v18 = vld [vmem:[%s4806_s10 + $0xd10] sm:$0xff]  ;;  %v632_v19 = vld [vmem:[%s4806_s10 + $0xd18] sm:$0xff] }
  0x7f   : > { %625 = vst [vmem:[%s4814_s11 + $0x678] sm:$0xff] %v624_v15  ;;  %627 = vst [vmem:[%s4814_s11 + $0x680] sm:$0xff] %v626_v16  ;;  %v634_v20 = vld [vmem:[%s4806_s10 + $0xd40] sm:$0xff]  ;;  %v636_v21 = vld [vmem:[%s4806_s10 + $0xd48] sm:$0xff] }
  0x80   : > { %629 = vst [vmem:[%s4814_s11 + $0x688] sm:$0xff] %v628_v17  ;;  %631 = vst [vmem:[%s4814_s11 + $0x690] sm:$0xff] %v630_v18  ;;  %v638_v22 = vld [vmem:[%s4806_s10 + $0xd50] sm:$0xff]  ;;  %v640_v23 = vld [vmem:[%s4806_s10 + $0xd58] sm:$0xff] }
  0x81   : > { %633 = vst [vmem:[%s4814_s11 + $0x698] sm:$0xff] %v632_v19  ;;  %635 = vst [vmem:[%s4814_s11 + $0x6a0] sm:$0xff] %v634_v20  ;;  %v642_v24 = vld [vmem:[%s4806_s10 + $0xd80] sm:$0xff]  ;;  %v644_v25 = vld [vmem:[%s4806_s10 + $0xd88] sm:$0xff] }
  0x82   : > { %637 = vst [vmem:[%s4814_s11 + $0x6a8] sm:$0xff] %v636_v21  ;;  %639 = vst [vmem:[%s4814_s11 + $0x6b0] sm:$0xff] %v638_v22  ;;  %v646_v26 = vld [vmem:[%s4806_s10 + $0xd90] sm:$0xff]  ;;  %v648_v27 = vld [vmem:[%s4806_s10 + $0xd98] sm:$0xff] }
  0x83   : > { %641 = vst [vmem:[%s4814_s11 + $0x6b8] sm:$0xff] %v640_v23  ;;  %643 = vst [vmem:[%s4814_s11 + $0x6c0] sm:$0xff] %v642_v24  ;;  %v650_v28 = vld [vmem:[%s4806_s10 + $0xdc0] sm:$0xff]  ;;  %v652_v29 = vld [vmem:[%s4806_s10 + $0xdc8] sm:$0xff] }
  0x84   : > { %645 = vst [vmem:[%s4814_s11 + $0x6c8] sm:$0xff] %v644_v25  ;;  %647 = vst [vmem:[%s4814_s11 + $0x6d0] sm:$0xff] %v646_v26  ;;  %v654_v30 = vld [vmem:[%s4806_s10 + $0xdd0] sm:$0xff]  ;;  %v656_v31 = vld [vmem:[%s4806_s10 + $0xdd8] sm:$0xff] }
  0x85   : > { %649 = vst [vmem:[%s4814_s11 + $0x6d8] sm:$0xff] %v648_v27  ;;  %651 = vst [vmem:[%s4814_s11 + $0x6e0] sm:$0xff] %v650_v28  ;;  %v658_v32 = vld [vmem:[%s4806_s10 + $0xe00] sm:$0xff]  ;;  %v660_v33 = vld [vmem:[%s4806_s10 + $0xe08] sm:$0xff] }
  0x86   : > { %653 = vst [vmem:[%s4814_s11 + $0x6e8] sm:$0xff] %v652_v29  ;;  %655 = vst [vmem:[%s4814_s11 + $0x6f0] sm:$0xff] %v654_v30  ;;  %v662_v34 = vld [vmem:[%s4806_s10 + $0xe10] sm:$0xff]  ;;  %v664_v35 = vld [vmem:[%s4806_s10 + $0xe18] sm:$0xff] }
  0x87   : > { %657 = vst [vmem:[%s4814_s11 + $0x6f8] sm:$0xff] %v656_v31  ;;  %659 = vst [vmem:[%s4814_s11 + $0x700] sm:$0xff] %v658_v32  ;;  %v666_v36 = vld [vmem:[%s4806_s10 + $0xe40] sm:$0xff]  ;;  %v668_v37 = vld [vmem:[%s4806_s10 + $0xe48] sm:$0xff] }
  0x88   : > { %661 = vst [vmem:[%s4814_s11 + $0x708] sm:$0xff] %v660_v33  ;;  %663 = vst [vmem:[%s4814_s11 + $0x710] sm:$0xff] %v662_v34  ;;  %v670_v38 = vld [vmem:[%s4806_s10 + $0xe50] sm:$0xff]  ;;  %v672_v39 = vld [vmem:[%s4806_s10 + $0xe58] sm:$0xff] }
  0x89   : > { %665 = vst [vmem:[%s4814_s11 + $0x718] sm:$0xff] %v664_v35  ;;  %667 = vst [vmem:[%s4814_s11 + $0x720] sm:$0xff] %v666_v36  ;;  %v674_v40 = vld [vmem:[%s4806_s10 + $0xe80] sm:$0xff]  ;;  %v676_v41 = vld [vmem:[%s4806_s10 + $0xe88] sm:$0xff] }
  0x8a   : > { %669 = vst [vmem:[%s4814_s11 + $0x728] sm:$0xff] %v668_v37  ;;  %671 = vst [vmem:[%s4814_s11 + $0x730] sm:$0xff] %v670_v38  ;;  %v678_v42 = vld [vmem:[%s4806_s10 + $0xe90] sm:$0xff]  ;;  %v680_v43 = vld [vmem:[%s4806_s10 + $0xe98] sm:$0xff] }
  0x8b   : > { %673 = vst [vmem:[%s4814_s11 + $0x738] sm:$0xff] %v672_v39  ;;  %675 = vst [vmem:[%s4814_s11 + $0x740] sm:$0xff] %v674_v40  ;;  %v682_v44 = vld [vmem:[%s4806_s10 + $0xec0] sm:$0xff]  ;;  %v684_v45 = vld [vmem:[%s4806_s10 + $0xec8] sm:$0xff] }
  0x8c   : > { %677 = vst [vmem:[%s4814_s11 + $0x748] sm:$0xff] %v676_v41  ;;  %679 = vst [vmem:[%s4814_s11 + $0x750] sm:$0xff] %v678_v42  ;;  %v686_v46 = vld [vmem:[%s4806_s10 + $0xed0] sm:$0xff]  ;;  %v688_v47 = vld [vmem:[%s4806_s10 + $0xed8] sm:$0xff] }
  0x8d   : > { %681 = vst [vmem:[%s4814_s11 + $0x758] sm:$0xff] %v680_v43  ;;  %683 = vst [vmem:[%s4814_s11 + $0x760] sm:$0xff] %v682_v44  ;;  %v690_v48 = vld [vmem:[%s4806_s10 + $0xf00] sm:$0xff]  ;;  %v692_v49 = vld [vmem:[%s4806_s10 + $0xf08] sm:$0xff] }
  0x8e   : > { %685 = vst [vmem:[%s4814_s11 + $0x768] sm:$0xff] %v684_v45  ;;  %687 = vst [vmem:[%s4814_s11 + $0x770] sm:$0xff] %v686_v46  ;;  %v694_v50 = vld [vmem:[%s4806_s10 + $0xf10] sm:$0xff]  ;;  %v696_v51 = vld [vmem:[%s4806_s10 + $0xf18] sm:$0xff] }
  0x8f   : > { %689 = vst [vmem:[%s4814_s11 + $0x778] sm:$0xff] %v688_v47  ;;  %691 = vst [vmem:[%s4814_s11 + $0x780] sm:$0xff] %v690_v48  ;;  %v698_v52 = vld [vmem:[%s4806_s10 + $0xf40] sm:$0xff]  ;;  %v700_v53 = vld [vmem:[%s4806_s10 + $0xf48] sm:$0xff] }
  0x90   : > { %693 = vst [vmem:[%s4814_s11 + $0x788] sm:$0xff] %v692_v49  ;;  %695 = vst [vmem:[%s4814_s11 + $0x790] sm:$0xff] %v694_v50  ;;  %v702_v54 = vld [vmem:[%s4806_s10 + $0xf50] sm:$0xff]  ;;  %v704_v55 = vld [vmem:[%s4806_s10 + $0xf58] sm:$0xff] }
  0x91   : > { %697 = vst [vmem:[%s4814_s11 + $0x798] sm:$0xff] %v696_v51  ;;  %699 = vst [vmem:[%s4814_s11 + $0x7a0] sm:$0xff] %v698_v52  ;;  %v706_v56 = vld [vmem:[%s4806_s10 + $0xf80] sm:$0xff]  ;;  %v708_v57 = vld [vmem:[%s4806_s10 + $0xf88] sm:$0xff] }
  0x92   : > { %701 = vst [vmem:[%s4814_s11 + $0x7a8] sm:$0xff] %v700_v53  ;;  %703 = vst [vmem:[%s4814_s11 + $0x7b0] sm:$0xff] %v702_v54  ;;  %v710_v58 = vld [vmem:[%s4806_s10 + $0xf90] sm:$0xff]  ;;  %v712_v59 = vld [vmem:[%s4806_s10 + $0xf98] sm:$0xff] }
  0x93   : > { %705 = vst [vmem:[%s4814_s11 + $0x7b8] sm:$0xff] %v704_v55  ;;  %707 = vst [vmem:[%s4814_s11 + $0x7c0] sm:$0xff] %v706_v56  ;;  %v714_v60 = vld [vmem:[%s4806_s10 + $0xfc0] sm:$0xff]  ;;  %v716_v61 = vld [vmem:[%s4806_s10 + $0xfc8] sm:$0xff] }
  0x94   : > { %709 = vst [vmem:[%s4814_s11 + $0x7c8] sm:$0xff] %v708_v57  ;;  %711 = vst [vmem:[%s4814_s11 + $0x7d0] sm:$0xff] %v710_v58  ;;  %v718_v62 = vld [vmem:[%s4806_s10 + $0xfd0] sm:$0xff]  ;;  %v720_v63 = vld [vmem:[%s4806_s10 + $0xfd8] sm:$0xff] }
  0x95   : > { %713 = vst [vmem:[%s4814_s11 + $0x7d8] sm:$0xff] %v712_v59  ;;  %715 = vst [vmem:[%s4814_s11 + $0x7e0] sm:$0xff] %v714_v60  ;;  %v722_v0 = vld [vmem:[%s4806_s10 + $0x1000] sm:$0xff]  ;;  %v724_v1 = vld [vmem:[%s4806_s10 + $0x1008] sm:$0xff] }
  0x96   : > { %717 = vst [vmem:[%s4814_s11 + $0x7e8] sm:$0xff] %v716_v61  ;;  %719 = vst [vmem:[%s4814_s11 + $0x7f0] sm:$0xff] %v718_v62  ;;  %v726_v2 = vld [vmem:[%s4806_s10 + $0x1010] sm:$0xff]  ;;  %v728_v3 = vld [vmem:[%s4806_s10 + $0x1018] sm:$0xff] }
  0x97   : > { %721 = vst [vmem:[%s4814_s11 + $0x7f8] sm:$0xff] %v720_v63  ;;  %723 = vst [vmem:[%s4814_s11 + $0x800] sm:$0xff] %v722_v0  ;;  %v730_v4 = vld [vmem:[%s4806_s10 + $0x1040] sm:$0xff]  ;;  %v732_v5 = vld [vmem:[%s4806_s10 + $0x1048] sm:$0xff] }
  0x98   : > { %725 = vst [vmem:[%s4814_s11 + $0x808] sm:$0xff] %v724_v1  ;;  %727 = vst [vmem:[%s4814_s11 + $0x810] sm:$0xff] %v726_v2  ;;  %v734_v6 = vld [vmem:[%s4806_s10 + $0x1050] sm:$0xff]  ;;  %v736_v7 = vld [vmem:[%s4806_s10 + $0x1058] sm:$0xff] }
  0x99   : > { %729 = vst [vmem:[%s4814_s11 + $0x818] sm:$0xff] %v728_v3  ;;  %731 = vst [vmem:[%s4814_s11 + $0x820] sm:$0xff] %v730_v4  ;;  %v738_v8 = vld [vmem:[%s4806_s10 + $0x1080] sm:$0xff]  ;;  %v740_v9 = vld [vmem:[%s4806_s10 + $0x1088] sm:$0xff] }
  0x9a   : > { %733 = vst [vmem:[%s4814_s11 + $0x828] sm:$0xff] %v732_v5  ;;  %735 = vst [vmem:[%s4814_s11 + $0x830] sm:$0xff] %v734_v6  ;;  %v742_v10 = vld [vmem:[%s4806_s10 + $0x1090] sm:$0xff]  ;;  %v744_v11 = vld [vmem:[%s4806_s10 + $0x1098] sm:$0xff] }
  0x9b   : > { %737 = vst [vmem:[%s4814_s11 + $0x838] sm:$0xff] %v736_v7  ;;  %739 = vst [vmem:[%s4814_s11 + $0x840] sm:$0xff] %v738_v8  ;;  %v746_v12 = vld [vmem:[%s4806_s10 + $0x10c0] sm:$0xff]  ;;  %v748_v13 = vld [vmem:[%s4806_s10 + $0x10c8] sm:$0xff] }
  0x9c   : > { %741 = vst [vmem:[%s4814_s11 + $0x848] sm:$0xff] %v740_v9  ;;  %743 = vst [vmem:[%s4814_s11 + $0x850] sm:$0xff] %v742_v10  ;;  %v750_v14 = vld [vmem:[%s4806_s10 + $0x10d0] sm:$0xff]  ;;  %v752_v15 = vld [vmem:[%s4806_s10 + $0x10d8] sm:$0xff] }
  0x9d   : > { %745 = vst [vmem:[%s4814_s11 + $0x858] sm:$0xff] %v744_v11  ;;  %747 = vst [vmem:[%s4814_s11 + $0x860] sm:$0xff] %v746_v12  ;;  %v754_v16 = vld [vmem:[%s4806_s10 + $0x1100] sm:$0xff]  ;;  %v756_v17 = vld [vmem:[%s4806_s10 + $0x1108] sm:$0xff] }
  0x9e   : > { %749 = vst [vmem:[%s4814_s11 + $0x868] sm:$0xff] %v748_v13  ;;  %751 = vst [vmem:[%s4814_s11 + $0x870] sm:$0xff] %v750_v14  ;;  %v758_v18 = vld [vmem:[%s4806_s10 + $0x1110] sm:$0xff]  ;;  %v760_v19 = vld [vmem:[%s4806_s10 + $0x1118] sm:$0xff] }
  0x9f   : > { %753 = vst [vmem:[%s4814_s11 + $0x878] sm:$0xff] %v752_v15  ;;  %755 = vst [vmem:[%s4814_s11 + $0x880] sm:$0xff] %v754_v16  ;;  %v762_v20 = vld [vmem:[%s4806_s10 + $0x1140] sm:$0xff]  ;;  %v764_v21 = vld [vmem:[%s4806_s10 + $0x1148] sm:$0xff] }
  0xa0   : > { %757 = vst [vmem:[%s4814_s11 + $0x888] sm:$0xff] %v756_v17  ;;  %759 = vst [vmem:[%s4814_s11 + $0x890] sm:$0xff] %v758_v18  ;;  %v766_v22 = vld [vmem:[%s4806_s10 + $0x1150] sm:$0xff]  ;;  %v768_v23 = vld [vmem:[%s4806_s10 + $0x1158] sm:$0xff] }
  0xa1   : > { %761 = vst [vmem:[%s4814_s11 + $0x898] sm:$0xff] %v760_v19  ;;  %763 = vst [vmem:[%s4814_s11 + $0x8a0] sm:$0xff] %v762_v20  ;;  %v770_v24 = vld [vmem:[%s4806_s10 + $0x1180] sm:$0xff]  ;;  %v772_v25 = vld [vmem:[%s4806_s10 + $0x1188] sm:$0xff] }
  0xa2   : > { %765 = vst [vmem:[%s4814_s11 + $0x8a8] sm:$0xff] %v764_v21  ;;  %767 = vst [vmem:[%s4814_s11 + $0x8b0] sm:$0xff] %v766_v22  ;;  %v774_v26 = vld [vmem:[%s4806_s10 + $0x1190] sm:$0xff]  ;;  %v776_v27 = vld [vmem:[%s4806_s10 + $0x1198] sm:$0xff] }
  0xa3   : > { %769 = vst [vmem:[%s4814_s11 + $0x8b8] sm:$0xff] %v768_v23  ;;  %771 = vst [vmem:[%s4814_s11 + $0x8c0] sm:$0xff] %v770_v24  ;;  %v778_v28 = vld [vmem:[%s4806_s10 + $0x11c0] sm:$0xff]  ;;  %v780_v29 = vld [vmem:[%s4806_s10 + $0x11c8] sm:$0xff] }
  0xa4   : > { %773 = vst [vmem:[%s4814_s11 + $0x8c8] sm:$0xff] %v772_v25  ;;  %775 = vst [vmem:[%s4814_s11 + $0x8d0] sm:$0xff] %v774_v26  ;;  %v782_v30 = vld [vmem:[%s4806_s10 + $0x11d0] sm:$0xff]  ;;  %v784_v31 = vld [vmem:[%s4806_s10 + $0x11d8] sm:$0xff] }
  0xa5   : > { %777 = vst [vmem:[%s4814_s11 + $0x8d8] sm:$0xff] %v776_v27  ;;  %779 = vst [vmem:[%s4814_s11 + $0x8e0] sm:$0xff] %v778_v28 }
  0xa6   : > { %781 = vst [vmem:[%s4814_s11 + $0x8e8] sm:$0xff] %v780_v29  ;;  %783 = vst [vmem:[%s4814_s11 + $0x8f0] sm:$0xff] %v782_v30 }
  0xa7   : > { %785 = vst [vmem:[%s4814_s11 + $0x8f8] sm:$0xff] %v784_v31 }
  0xa8 PF: > { %p4047_p10 = scmp.ge.s32.totalorder %s4715_s21, 1  ;;  %p807_p11 = scmp.lt.s32.totalorder %s4715_s21, 3 }
  0xaa   : > { %p808_p12 = pnand %p4047_p10, %p807_p11 }
  0xab   : > { %s5389_s12 = sand.u32 (!%p808_p12), 1, %s4707_s19   ;;  %v1163_v32 = vlaneseq (!%p808_p12)  ;;  %v4717_v33 = vmov (!%p808_p12), 1966171168   ;;  %v5397_v36 = vld [vmem:[%s5899_s0] sm:$0x1f] (!%p808_p12)  ;;  %vm2687_vm0 = vcmask (!%p808_p12), 523264  }
  0xac   : > { %811 = sbr.rel (%p808_p12) target bundleno = 906 (0x38a), region = 55  ;;  %v1206_v34 = vunpack.c.l.s4 (!%p808_p12), %v4717_v33  ;;  %v1204_v20 = vcombine.high (!%p808_p12), %v5397_v36, %v5397_v36  ;;  %s4050_s17 = sshll.u32 (!%p808_p12), %s4772_s22, 7 }
  0xad   : > { %s4545_s13 = smul.u32 (!%p808_p12), 2304, %s5389_s12  ;;  %v5392_v35 = vshrl.u32 (!%p808_p12), %v1163_v32, 7  ;;  %p861_p13 = scmp.lt.s32.totalorder (!%p808_p12), %s4050_s17, 255 }
  0xae   : > { %v1207_v37 = vunpack.c.0.s8 (!%p808_p12), %v1206_v34  ;;  %s4049_s6 = sshll.u32 (!%p808_p12), %s4772_s22, 3  ;;  %s4048_s10 = sshll.u32 (!%p808_p12), %s5389_s12, 4 }
  0xaf   : > { %s5399_s16 = scalar_lea.vmem (!%p808_p12), [#allocation2], %s4545_s13  ;;  %p856_p0 = scmp.lt.s32.totalorder (!%p808_p12), %s4049_s6, 15 }
  0xb0   : > { %v873_v38 = vld [vmem:[%s5399_s16] sm:$0xff] (!%p808_p12)  ;;  %v874_v40 = vld [vmem:[%s5399_s16 + $0x8] sm:$0xff] (!%p808_p12)  ;;  %v5408_v46 = vsub.s32 (!%p808_p12), %v1207_v37, %v5392_v35  ;;  %s5815_s11 = scalar_lea.vmem (!%p808_p12), [#allocation3], %s4048_s10  ;;  %s4415_s13 = sshll.u32 (!%p808_p12), %s4772_s22, 8 }
  0xb1   : > { %v877_v39 = vld [vmem:[%s5399_s16 + $0x20] sm:$0xff] (!%p808_p12)  ;;  %v878_v42 = vld [vmem:[%s5399_s16 + $0x28] sm:$0xff] (!%p808_p12)  ;;  %s4720_s26 = smov (!%p808_p12), [#allocation3]  }
  0xb2   : > { %v4054_v41 = vcombine.high (!%p808_p12), %v873_v38, %v877_v39  ;;  %v4053_v43 = vcombine.low (!%p808_p12), %v873_v38, %v877_v39  ;;  %v881_v44 = vld [vmem:[%s5399_s16 + $0x40] sm:$0xff] (!%p808_p12)  ;;  %v4056_v47 = vcombine.high (!%p808_p12), %v874_v40, %v878_v42  ;;  %v4055_v48 = vcombine.low (!%p808_p12), %v874_v40, %v878_v42  ;;  %v882_v50 = vld [vmem:[%s5399_s16 + $0x48] sm:$0xff] (!%p808_p12) }
  0xb3   : > { %v885_v45 = vld [vmem:[%s5399_s16 + $0x60] sm:$0xff]  ;;  %v886_v51 = vld [vmem:[%s5399_s16 + $0x68] sm:$0xff]  ;;  %v5418_v57 = vrot.slane %v5397_v36, %v5408_v46  ;;  %v1218_v24 = vrot.slane %v1204_v20, %v5408_v46  ;;  %s5912_s17 = smov (!%p861_p13, %s4050_s17), 255  ;;  %s5914_s6 = smov (!%p856_p0, %s4049_s6), 15 }
  0xb4   : > { %v4062_v49 = vcombine.high %v881_v44, %v885_v45  ;;  %v889_v52 = vld [vmem:[%s5399_s16 + $0x80] sm:$0xff]  ;;  %2691 = vmatprep.subr.bf16.mxu0 %v4054_v41  ;;  %v4064_v53 = vcombine.high %v882_v50, %v886_v51  ;;  %v890_v55 = vld [vmem:[%s5399_s16 + $0x88] sm:$0xff]  ;;  %2814 = vmatprep.subr.bf16.mxu1 %v4056_v47  ;;  %v4061_v58 = vcombine.low %v881_v44, %v885_v45  ;;  %s4051_s23 = sshll.u32 %s5912_s17, 2  ;;  %s858_s9 = scalar_lea.vmem %s5901_s2, %s5914_s6 }
  0xb5   : > { %v893_v54 = vld [vmem:[%s5399_s16 + $0xa0] sm:$0xff]  ;;  %v894_v56 = vld [vmem:[%s5399_s16 + $0xa8] sm:$0xff]  ;;  %2692 = vmatpush1.bf16.msra.mxu0 %v4053_v43  ;;  %2815 = vmatpush1.bf16.msra.mxu1 %v4055_v48  ;;  %v4063_v59 = vcombine.low %v882_v50, %v886_v51  ;;  %v1219_v2 = vcombine.high %v5418_v57, %v5418_v57  ;;  %v5447_v30 = vrot.slane %v1218_v24, %v5408_v46  ;;  %s5630_s30 = scalar_lea.vmem %s5902_s3, %s4051_s23  ;;  %s3929_s17 = sshll.u32 %s5815_s11, 4  ;;  %s3930_s17 = int_to_ptr.vmem [resolvable:$true] %s3929_s17 }
  0xb6   : > { %2693 = vmatprep.subr.bf16.mxu0 %v4062_v49  ;;  %v4070_v60 = vcombine.high %v889_v52, %v893_v54  ;;  %2816 = vmatprep.subr.bf16.mxu1 %v4064_v53  ;;  %v4072_v61 = vcombine.high %v890_v55, %v894_v56  ;;  %v897_v62 = vld [vmem:[%s5399_s16 + $0xc0] sm:$0xff]  ;;  %v898_v0 = vld [vmem:[%s5399_s16 + $0xc8] sm:$0xff]  ;;  %v4069_v3 = vcombine.low %v889_v52, %v893_v54  ;;  %s3911_s23 = scalar_lea.sflag [#allocation4], %s5389_s12  ;;  %s4653_s25 = scalar_lea.vmem %s3930_s17, 256 }
  0xb7   : > { %v901_v63 = vld [vmem:[%s5399_s16 + $0xe0] sm:$0xff]  ;;  %v902_v1 = vld [vmem:[%s5399_s16 + $0xe8] sm:$0xff]  ;;  %v4071_v4 = vcombine.low %v890_v55, %v894_v56  ;;  %v5427_v6 = vrot.slane %v1219_v2, %v5408_v46  ;;  %p4654_p1 = scmp.ne.s32.totalorder %s3930_s17, %s4653_s25 }
  0xb8   : > { %v4078_v5 = vcombine.high %v897_v62, %v901_v63  ;;  %v4080_v7 = vcombine.high %v898_v0, %v902_v1  ;;  %v905_v8 = vld [vmem:[%s5399_s16 + $0x100] sm:$0xff]  ;;  %v906_v10 = vld [vmem:[%s5399_s16 + $0x108] sm:$0xff]  ;;  %v4077_v12 = vcombine.low %v897_v62, %v901_v63  ;;  %v4079_v13 = vcombine.low %v898_v0, %v902_v1 }
  0xb9   : > { %2694 = vmatpush1.bf16.msra.mxu0 %v4061_v58  ;;  %2817 = vmatpush1.bf16.msra.mxu1 %v4063_v59  ;;  %v909_v9 = vld [vmem:[%s5399_s16 + $0x120] sm:$0xff]  ;;  %v910_v11 = vld [vmem:[%s5399_s16 + $0x128] sm:$0xff]  ;;  %p4655_p2 = pnand %p4654_p1, %p4790_p6 }
  0xba   : > { %2695 = vmatprep.subr.bf16.mxu0 %v4070_v60  ;;  %2818 = vmatprep.subr.bf16.mxu1 %v4072_v61  ;;  %v4086_v14 = vcombine.high %v905_v8, %v909_v9  ;;  %v4088_v15 = vcombine.high %v906_v10, %v910_v11  ;;  %v913_v16 = vld [vmem:[%s5399_s16 + $0x140] sm:$0xff]  ;;  %v914_v18 = vld [vmem:[%s5399_s16 + $0x148] sm:$0xff]  ;;  %v4085_v21 = vcombine.low %v905_v8, %v909_v9 }
  0xbb   : > { %2723 = vmatprep.mubr.bf16.mxu0 %v5427_v6  ;;  %2846 = vmatprep.mubr.bf16.mxu1 %v5427_v6  ;;  %v917_v17 = vld [vmem:[%s5399_s16 + $0x160] sm:$0xff]  ;;  %v918_v19 = vld [vmem:[%s5399_s16 + $0x168] sm:$0xff]  ;;  %v4087_v22 = vcombine.low %v906_v10, %v910_v11  ;;  %p4656_p3 = pneg %p4655_p2 }
  0xbc   : > { %v4094_v23 = vcombine.high %v913_v16, %v917_v17  ;;  %v4096_v25 = vcombine.high %v914_v18, %v918_v19  ;;  %v921_v26 = vld [vmem:[%s5399_s16 + $0x180] sm:$0xff]  ;;  %v922_v28 = vld [vmem:[%s5399_s16 + $0x188] sm:$0xff]  ;;  %v4093_v31 = vcombine.low %v913_v16, %v917_v17  ;;  %v4095_v32 = vcombine.low %v914_v18, %v918_v19 }
  0xbd   : > { %2696 = vmatpush1.bf16.msra.mxu0 %v4069_v3  ;;  %2819 = vmatpush1.bf16.msra.mxu1 %v4071_v4  ;;  %v925_v27 = vld [vmem:[%s5399_s16 + $0x1a0] sm:$0xff]  ;;  %v926_v29 = vld [vmem:[%s5399_s16 + $0x1a8] sm:$0xff] }
  0xbe   : > { %2697 = vmatprep.subr.bf16.mxu0 %v4078_v5  ;;  %2820 = vmatprep.subr.bf16.mxu1 %v4080_v7  ;;  %v4102_v33 = vcombine.high %v921_v26, %v925_v27  ;;  %v4104_v34 = vcombine.high %v922_v28, %v926_v29  ;;  %v929_v36 = vld [vmem:[%s5399_s16 + $0x1c0] sm:$0xff]  ;;  %v930_v38 = vld [vmem:[%s5399_s16 + $0x1c8] sm:$0xff]  ;;  %v4101_v40 = vcombine.low %v921_v26, %v925_v27 }
  0xbf   : > { %v933_v37 = vld [vmem:[%s5399_s16 + $0x1e0] sm:$0xff]  ;;  %v934_v39 = vld [vmem:[%s5399_s16 + $0x1e8] sm:$0xff]  ;;  %v4103_v41 = vcombine.low %v922_v28, %v926_v29 }
  0xc0   : > { %v4110_v42 = vcombine.high %v929_v36, %v933_v37  ;;  %v4112_v43 = vcombine.high %v930_v38, %v934_v39  ;;  %v937_v44 = vld [vmem:[%s5399_s16 + $0x200] sm:$0xff]  ;;  %v938_v47 = vld [vmem:[%s5399_s16 + $0x208] sm:$0xff]  ;;  %v4109_v49 = vcombine.low %v929_v36, %v933_v37  ;;  %v4111_v50 = vcombine.low %v930_v38, %v934_v39 }
  0xc1   : > { %2698 = vmatpush1.bf16.msra.mxu0 %v4077_v12  ;;  %2821 = vmatpush1.bf16.msra.mxu1 %v4079_v13  ;;  %v941_v45 = vld [vmem:[%s5399_s16 + $0x220] sm:$0xff]  ;;  %v942_v48 = vld [vmem:[%s5399_s16 + $0x228] sm:$0xff] }
  0xc2   : > { %2699 = vmatprep.subr.bf16.mxu0 %v4086_v14  ;;  %2822 = vmatprep.subr.bf16.mxu1 %v4088_v15  ;;  %v4118_v51 = vcombine.high %v937_v44, %v941_v45  ;;  %v4120_v52 = vcombine.high %v938_v47, %v942_v48  ;;  %v945_v53 = vld [vmem:[%s5399_s16 + $0x240] sm:$0xff]  ;;  %v946_v55 = vld [vmem:[%s5399_s16 + $0x248] sm:$0xff]  ;;  %v4117_v58 = vcombine.low %v937_v44, %v941_v45 }
  0xc3   : > { %v949_v54 = vld [vmem:[%s5399_s16 + $0x260] sm:$0xff]  ;;  %v950_v56 = vld [vmem:[%s5399_s16 + $0x268] sm:$0xff]  ;;  %v4119_v59 = vcombine.low %v938_v47, %v942_v48 }
  0xc4   : > { %v4126_v60 = vcombine.high %v945_v53, %v949_v54  ;;  %v4128_v61 = vcombine.high %v946_v55, %v950_v56  ;;  %v953_v62 = vld [vmem:[%s5399_s16 + $0x280] sm:$0xff]  ;;  %v954_v0 = vld [vmem:[%s5399_s16 + $0x288] sm:$0xff]  ;;  %v4125_v2 = vcombine.low %v945_v53, %v949_v54  ;;  %v4127_v3 = vcombine.low %v946_v55, %v950_v56 }
  0xc5   : > { %2700 = vmatpush1.bf16.msra.mxu0 %v4085_v21  ;;  %2823 = vmatpush1.bf16.msra.mxu1 %v4087_v22  ;;  %v957_v63 = vld [vmem:[%s5399_s16 + $0x2a0] sm:$0xff]  ;;  %v958_v1 = vld [vmem:[%s5399_s16 + $0x2a8] sm:$0xff] }
  0xc6   : > { %2701 = vmatprep.subr.bf16.mxu0 %v4094_v23  ;;  %2824 = vmatprep.subr.bf16.mxu1 %v4096_v25  ;;  %v4134_v4 = vcombine.high %v953_v62, %v957_v63  ;;  %v4136_v5 = vcombine.high %v954_v0, %v958_v1  ;;  %v961_v7 = vld [vmem:[%s5399_s16 + $0x2c0] sm:$0xff]  ;;  %v962_v9 = vld [vmem:[%s5399_s16 + $0x2c8] sm:$0xff]  ;;  %v4133_v11 = vcombine.low %v953_v62, %v957_v63 }
  0xc7   : > { %v965_v8 = vld [vmem:[%s5399_s16 + $0x2e0] sm:$0xff]  ;;  %v966_v10 = vld [vmem:[%s5399_s16 + $0x2e8] sm:$0xff]  ;;  %v4135_v12 = vcombine.low %v954_v0, %v958_v1 }
  0xc8   : > { %v4142_v13 = vcombine.high %v961_v7, %v965_v8  ;;  %v4144_v14 = vcombine.high %v962_v9, %v966_v10  ;;  %v969_v15 = vld [vmem:[%s5399_s16 + $0x300] sm:$0xff]  ;;  %v970_v17 = vld [vmem:[%s5399_s16 + $0x308] sm:$0xff]  ;;  %v4141_v19 = vcombine.low %v961_v7, %v965_v8  ;;  %v4143_v20 = vcombine.low %v962_v9, %v966_v10 }
  0xc9   : > { %2702 = vmatpush1.bf16.msra.mxu0 %v4093_v31  ;;  %2825 = vmatpush1.bf16.msra.mxu1 %v4095_v32  ;;  %v973_v16 = vld [vmem:[%s5399_s16 + $0x320] sm:$0xff]  ;;  %v974_v18 = vld [vmem:[%s5399_s16 + $0x328] sm:$0xff]  ;;  %v5501_v7 = vcombine.high %v5427_v6, %v5427_v6 }
  0xca   : > { %2703 = vmatprep.subr.bf16.mxu0 %v4102_v33  ;;  %2826 = vmatprep.subr.bf16.mxu1 %v4104_v34  ;;  %v4150_v21 = vcombine.high %v969_v15, %v973_v16  ;;  %v4152_v22 = vcombine.high %v970_v17, %v974_v18  ;;  %v977_v23 = vld [vmem:[%s5399_s16 + $0x340] sm:$0xff]  ;;  %v978_v25 = vld [vmem:[%s5399_s16 + $0x348] sm:$0xff]  ;;  %v4149_v27 = vcombine.low %v969_v15, %v973_v16 }
  0xcb   : > { %v981_v24 = vld [vmem:[%s5399_s16 + $0x360] sm:$0xff]  ;;  %v982_v26 = vld [vmem:[%s5399_s16 + $0x368] sm:$0xff]  ;;  %v4151_v28 = vcombine.low %v970_v17, %v974_v18 }
  0xcc   : > { %v4158_v29 = vcombine.high %v977_v23, %v981_v24  ;;  %v4160_v31 = vcombine.high %v978_v25, %v982_v26  ;;  %v985_v32 = vld [vmem:[%s5399_s16 + $0x380] sm:$0xff]  ;;  %v986_v34 = vld [vmem:[%s5399_s16 + $0x388] sm:$0xff]  ;;  %v4157_v37 = vcombine.low %v977_v23, %v981_v24  ;;  %v4159_v38 = vcombine.low %v978_v25, %v982_v26 }
  0xcd   : > { %2704 = vmatpush1.bf16.msra.mxu0 %v4101_v40  ;;  %2827 = vmatpush1.bf16.msra.mxu1 %v4103_v41  ;;  %v989_v33 = vld [vmem:[%s5399_s16 + $0x3a0] sm:$0xff]  ;;  %v990_v36 = vld [vmem:[%s5399_s16 + $0x3a8] sm:$0xff] }
  0xce   : > { %2705 = vmatprep.subr.bf16.mxu0 %v4110_v42  ;;  %2828 = vmatprep.subr.bf16.mxu1 %v4112_v43  ;;  %v4166_v39 = vcombine.high %v985_v32, %v989_v33  ;;  %v4168_v40 = vcombine.high %v986_v34, %v990_v36  ;;  %v993_v41 = vld [vmem:[%s5399_s16 + $0x3c0] sm:$0xff]  ;;  %v994_v43 = vld [vmem:[%s5399_s16 + $0x3c8] sm:$0xff]  ;;  %v4165_v45 = vcombine.low %v985_v32, %v989_v33 }
  0xcf   : > { %v997_v42 = vld [vmem:[%s5399_s16 + $0x3e0] sm:$0xff]  ;;  %v998_v44 = vld [vmem:[%s5399_s16 + $0x3e8] sm:$0xff]  ;;  %v4167_v47 = vcombine.low %v986_v34, %v990_v36 }
  0xd0   : > { %v4174_v48 = vcombine.high %v993_v41, %v997_v42  ;;  %v1006_v53 = vld [vmem:[%s5399_s16 + $0x428] sm:$0xff]  ;;  %v4173_v54 = vcombine.low %v993_v41, %v997_v42  ;;  %v4175_v55 = vcombine.low %v994_v43, %v998_v44 }
  0xd1   : > { %2706 = vmatpush1.bf16.msra.mxu0 %v4109_v49  ;;  %2829 = vmatpush1.bf16.msra.mxu1 %v4111_v50  ;;  %v4176_v49 = vcombine.high %v994_v43, %v998_v44  ;;  %v1001_v50 = vld [vmem:[%s5399_s16 + $0x400] sm:$0xff]  ;;  %v1010_v62 = vld [vmem:[%s5399_s16 + $0x448] sm:$0xff] }
  0xd2   : > { %2707 = vmatprep.subr.bf16.mxu0 %v4118_v51  ;;  %2830 = vmatprep.subr.bf16.mxu1 %v4120_v52  ;;  %v1005_v51 = vld [vmem:[%s5399_s16 + $0x420] sm:$0xff]  ;;  %v1002_v52 = vld [vmem:[%s5399_s16 + $0x408] sm:$0xff] }
  0xd3   : > { %v4182_v56 = vcombine.high %v1001_v50, %v1005_v51  ;;  %v1014_v63 = vld [vmem:[%s5399_s16 + $0x468] sm:$0xff]  ;;  %v4181_v0 = vcombine.low %v1001_v50, %v1005_v51  ;;  %v4183_v1 = vcombine.low %v1002_v52, %v1006_v53 }
  0xd4   : > { %v4191_v9 = vcombine.low %v1010_v62, %v1014_v63  ;;  %v1030_v15 = vld [vmem:[%s5399_s16 + $0x4e8] sm:$0xff] }
  0xd5   : > { %2708 = vmatpush1.bf16.msra.mxu0 %v4117_v58  ;;  %2831 = vmatpush1.bf16.msra.mxu1 %v4119_v59  ;;  %v4184_v58 = vcombine.high %v1002_v52, %v1006_v53  ;;  %v1009_v59 = vld [vmem:[%s5399_s16 + $0x440] sm:$0xff]  ;;  %v1038_v23 = vld [vmem:[%s5399_s16 + $0x528] sm:$0xff] }
  0xd6   : > { %2709 = vmatprep.subr.bf16.mxu0 %v4126_v60  ;;  %2832 = vmatprep.subr.bf16.mxu1 %v4128_v61  ;;  %v1013_v60 = vld [vmem:[%s5399_s16 + $0x460] sm:$0xff]  ;;  %v5493_v61 = vrot.slane %v5418_v57, %v5408_v46  ;;  %v1018_v46 = vld [vmem:[%s5399_s16 + $0x488] sm:$0xff] }
  0xd7   : > { %v1022_v57 = vld [vmem:[%s5399_s16 + $0x4a8] sm:$0xff]  ;;  %v4189_v8 = vcombine.low %v1009_v59, %v1013_v60 }
  0xd8   : > { %v4199_v17 = vcombine.low %v1018_v46, %v1022_v57  ;;  %v1046_v32 = vld [vmem:[%s5399_s16 + $0x568] sm:$0xff] }
  0xd9   : > { %2710 = vmatpush1.bf16.msra.mxu0 %v4125_v2  ;;  %2833 = vmatpush1.bf16.msra.mxu1 %v4127_v3  ;;  %v4190_v2 = vcombine.high %v1009_v59, %v1013_v60  ;;  %v4192_v3 = vcombine.high %v1010_v62, %v1014_v63  ;;  %v1054_v41 = vld [vmem:[%s5399_s16 + $0x5a8] sm:$0xff] }
  0xda   : > { %2711 = vmatprep.subr.bf16.mxu0 %v4134_v4  ;;  %2834 = vmatprep.subr.bf16.mxu1 %v4136_v5  ;;  %v1017_v4 = vld [vmem:[%s5399_s16 + $0x480] sm:$0xff]  ;;  %v1062_v50 = vld [vmem:[%s5399_s16 + $0x5e8] sm:$0xff] }
  0xdb   : > { %v1021_v5 = vld [vmem:[%s5399_s16 + $0x4a0] sm:$0xff]  ;;  %v1070_v59 = vld [vmem:[%s5399_s16 + $0x628] sm:$0xff] }
  0xdc   : > { %v4198_v10 = vcombine.high %v1017_v4, %v1021_v5  ;;  %v4197_v16 = vcombine.low %v1017_v4, %v1021_v5  ;;  %v1078_v4 = vld [vmem:[%s5399_s16 + $0x668] sm:$0xff] }
  0xdd   : > { %2712 = vmatpush1.bf16.msra.mxu0 %v4133_v11  ;;  %2835 = vmatpush1.bf16.msra.mxu1 %v4135_v12  ;;  %v4200_v11 = vcombine.high %v1018_v46, %v1022_v57  ;;  %v1025_v12 = vld [vmem:[%s5399_s16 + $0x4c0] sm:$0xff] }
  0xde   : > { %2713 = vmatprep.subr.bf16.mxu0 %v4142_v13  ;;  %2836 = vmatprep.subr.bf16.mxu1 %v4144_v14  ;;  %v1029_v13 = vld [vmem:[%s5399_s16 + $0x4e0] sm:$0xff]  ;;  %v1026_v14 = vld [vmem:[%s5399_s16 + $0x4c8] sm:$0xff] }
  0xdf   : > { %v4206_v18 = vcombine.high %v1025_v12, %v1029_v13  ;;  %v4205_v24 = vcombine.low %v1025_v12, %v1029_v13  ;;  %v4207_v25 = vcombine.low %v1026_v14, %v1030_v15  ;;  %v1086_v12 = vld [vmem:[%s5399_s16 + $0x6a8] sm:$0xff] }
  0xe1   : > { %2714 = vmatpush1.bf16.msra.mxu0 %v4141_v19  ;;  %2837 = vmatpush1.bf16.msra.mxu1 %v4143_v20  ;;  %v4208_v19 = vcombine.high %v1026_v14, %v1030_v15  ;;  %v1033_v20 = vld [vmem:[%s5399_s16 + $0x500] sm:$0xff] }
  0xe2   : > { %2715 = vmatprep.subr.bf16.mxu0 %v4150_v21  ;;  %2838 = vmatprep.subr.bf16.mxu1 %v4152_v22  ;;  %v1037_v21 = vld [vmem:[%s5399_s16 + $0x520] sm:$0xff]  ;;  %v1034_v22 = vld [vmem:[%s5399_s16 + $0x508] sm:$0xff] }
  0xe3   : > { %v4214_v26 = vcombine.high %v1033_v20, %v1037_v21  ;;  %v4213_v33 = vcombine.low %v1033_v20, %v1037_v21  ;;  %v4215_v34 = vcombine.low %v1034_v22, %v1038_v23  ;;  %v1094_v20 = vld [vmem:[%s5399_s16 + $0x6e8] sm:$0xff] }
  0xe5   : > { %2716 = vmatpush1.bf16.msra.mxu0 %v4149_v27  ;;  %2839 = vmatpush1.bf16.msra.mxu1 %v4151_v28  ;;  %v4216_v27 = vcombine.high %v1034_v22, %v1038_v23  ;;  %v1041_v28 = vld [vmem:[%s5399_s16 + $0x540] sm:$0xff] }
  0xe6   : > { %2717 = vmatprep.subr.bf16.mxu0 %v4158_v29  ;;  %2840 = vmatprep.subr.bf16.mxu1 %v4160_v31  ;;  %v1045_v29 = vld [vmem:[%s5399_s16 + $0x560] sm:$0xff]  ;;  %v1042_v31 = vld [vmem:[%s5399_s16 + $0x548] sm:$0xff] }
  0xe7   : > { %v4222_v36 = vcombine.high %v1041_v28, %v1045_v29  ;;  %v4221_v42 = vcombine.low %v1041_v28, %v1045_v29  ;;  %v4223_v43 = vcombine.low %v1042_v31, %v1046_v32  ;;  %v1102_v28 = vld [vmem:[%s5399_s16 + $0x728] sm:$0xff] }
  0xe9   : > { %2718 = vmatpush1.bf16.msra.mxu0 %v4157_v37  ;;  %2841 = vmatpush1.bf16.msra.mxu1 %v4159_v38  ;;  %v4224_v37 = vcombine.high %v1042_v31, %v1046_v32  ;;  %v1049_v38 = vld [vmem:[%s5399_s16 + $0x580] sm:$0xff] }
  0xea   : > { %2719 = vmatprep.subr.bf16.mxu0 %v4166_v39  ;;  %2842 = vmatprep.subr.bf16.mxu1 %v4168_v40  ;;  %v1053_v39 = vld [vmem:[%s5399_s16 + $0x5a0] sm:$0xff]  ;;  %v1050_v40 = vld [vmem:[%s5399_s16 + $0x588] sm:$0xff] }
  0xeb   : > { %v4230_v44 = vcombine.high %v1049_v38, %v1053_v39  ;;  %v4229_v51 = vcombine.low %v1049_v38, %v1053_v39  ;;  %v4231_v52 = vcombine.low %v1050_v40, %v1054_v41  ;;  %v1110_v38 = vld [vmem:[%s5399_s16 + $0x768] sm:$0xff] }
  0xed   : > { %2720 = vmatpush1.bf16.msra.mxu0 %v4165_v45  ;;  %2843 = vmatpush1.bf16.msra.mxu1 %v4167_v47  ;;  %v4232_v45 = vcombine.high %v1050_v40, %v1054_v41  ;;  %v1057_v47 = vld [vmem:[%s5399_s16 + $0x5c0] sm:$0xff] }
  0xee   : > { %2721 = vmatprep.subr.bf16.mxu0 %v4174_v48  ;;  %2844 = vmatprep.subr.bf16.mxu1 %v4176_v49  ;;  %v1061_v48 = vld [vmem:[%s5399_s16 + $0x5e0] sm:$0xff]  ;;  %v1058_v49 = vld [vmem:[%s5399_s16 + $0x5c8] sm:$0xff] }
  0xef   : > { %v4238_v53 = vcombine.high %v1057_v47, %v1061_v48  ;;  %v4237_v60 = vcombine.low %v1057_v47, %v1061_v48  ;;  %v4239_v62 = vcombine.low %v1058_v49, %v1062_v50  ;;  %v1118_v47 = vld [vmem:[%s5399_s16 + $0x7a8] sm:$0xff] }
  0xf1   : > { %2722 = vmatpush1.bf16.msra.mxu0 %v4173_v54  ;;  %2845 = vmatpush1.bf16.msra.mxu1 %v4175_v55  ;;  %v4240_v54 = vcombine.high %v1058_v49, %v1062_v50  ;;  %v1065_v55 = vld [vmem:[%s5399_s16 + $0x600] sm:$0xff] }
  0xf2   : > { %2732 = vmatprep.subr.bf16.mxu0 %v4182_v56  ;;  %2855 = vmatprep.subr.bf16.mxu1 %v4184_v58  ;;  %v1069_v56 = vld [vmem:[%s5399_s16 + $0x620] sm:$0xff]  ;;  %v1066_v58 = vld [vmem:[%s5399_s16 + $0x608] sm:$0xff] }
  0xf3   : > { %v4246_v63 = vcombine.high %v1065_v55, %v1069_v56  ;;  %v4245_v5 = vcombine.low %v1065_v55, %v1069_v56  ;;  %v4247_v46 = vcombine.low %v1066_v58, %v1070_v59  ;;  %v1126_v55 = vld [vmem:[%s5399_s16 + $0x7e8] sm:$0xff] }
  0xf4   : > { %2724 = vmatmul.mubr.bf16.vlgmr.msra.gmra.mrb[0].mxu0 %v5493_v61  ;;  %2847 = vmatmul.mubr.bf16.vlgmr.msra.gmra.mrb[0].mxu1 %v5493_v61 }
  0xf5   : > { %2733 = vmatpush1.bf16.msra.mxu0 %v4181_v0  ;;  %2856 = vmatpush1.bf16.msra.mxu1 %v4183_v1  ;;  %v4248_v0 = vcombine.high %v1066_v58, %v1070_v59  ;;  %v1073_v1 = vld [vmem:[%s5399_s16 + $0x640] sm:$0xff] }
  0xf6   : > { %2734 = vmatprep.subr.bf16.mxu0 %v4190_v2  ;;  %2857 = vmatprep.subr.bf16.mxu1 %v4192_v3  ;;  %v1077_v2 = vld [vmem:[%s5399_s16 + $0x660] sm:$0xff]  ;;  %v1074_v3 = vld [vmem:[%s5399_s16 + $0x648] sm:$0xff] }
  0xf7   : > { %2764 = vmatprep.mubr.bf16.mxu0 %v5501_v7  ;;  %2887 = vmatprep.mubr.bf16.mxu1 %v5501_v7  ;;  %v4254_v57 = vcombine.high %v1073_v1, %v1077_v2  ;;  %v4253_v13 = vcombine.low %v1073_v1, %v1077_v2  ;;  %v4255_v14 = vcombine.low %v1074_v3, %v1078_v4  ;;  %v1134_v1 = vld [vmem:[%s5399_s16 + $0x828] sm:$0xff] }
  0xf9   : > { %2735 = vmatpush1.bf16.msra.mxu0 %v4189_v8  ;;  %2858 = vmatpush1.bf16.msra.mxu1 %v4191_v9  ;;  %v4256_v8 = vcombine.high %v1074_v3, %v1078_v4  ;;  %v1081_v9 = vld [vmem:[%s5399_s16 + $0x680] sm:$0xff] }
  0xfa   : > { %2736 = vmatprep.subr.bf16.mxu0 %v4198_v10  ;;  %2859 = vmatprep.subr.bf16.mxu1 %v4200_v11  ;;  %v1085_v10 = vld [vmem:[%s5399_s16 + $0x6a0] sm:$0xff]  ;;  %v1082_v11 = vld [vmem:[%s5399_s16 + $0x688] sm:$0xff] }
  0xfb   : > { %v4262_v15 = vcombine.high %v1081_v9, %v1085_v10  ;;  %v4261_v21 = vcombine.low %v1081_v9, %v1085_v10  ;;  %v4263_v22 = vcombine.low %v1082_v11, %v1086_v12  ;;  %v1138_v9 = vld [vmem:[%s5399_s16 + $0x848] sm:$0xff] }
  0xfc   : > { %v1142_v10 = vld [vmem:[%s5399_s16 + $0x868] sm:$0xff] }
  0xfd   : > { %2737 = vmatpush1.bf16.msra.mxu0 %v4197_v16  ;;  %2860 = vmatpush1.bf16.msra.mxu1 %v4199_v17  ;;  %v4264_v16 = vcombine.high %v1082_v11, %v1086_v12  ;;  %v1089_v17 = vld [vmem:[%s5399_s16 + $0x6c0] sm:$0xff] }
  0xfe   : > { %2738 = vmatprep.subr.bf16.mxu0 %v4206_v18  ;;  %2861 = vmatprep.subr.bf16.mxu1 %v4208_v19  ;;  %v1093_v18 = vld [vmem:[%s5399_s16 + $0x6e0] sm:$0xff]  ;;  %v1090_v19 = vld [vmem:[%s5399_s16 + $0x6c8] sm:$0xff] }
  0xff   : > { %v4270_v23 = vcombine.high %v1089_v17, %v1093_v18  ;;  %v4269_v29 = vcombine.low %v1089_v17, %v1093_v18  ;;  %v4271_v31 = vcombine.low %v1090_v19, %v1094_v20  ;;  %v1146_v17 = vld [vmem:[%s5399_s16 + $0x888] sm:$0xff] }
 0x100   : > { %v1150_v18 = vld [vmem:[%s5399_s16 + $0x8a8] sm:$0xff] }
 0x101   : > { %2739 = vmatpush1.bf16.msra.mxu0 %v4205_v24  ;;  %2862 = vmatpush1.bf16.msra.mxu1 %v4207_v25  ;;  %v4272_v24 = vcombine.high %v1090_v19, %v1094_v20  ;;  %v1097_v25 = vld [vmem:[%s5399_s16 + $0x700] sm:$0xff]  ;;  %v4319_v20 = vcombine.low %v1138_v9, %v1142_v10 }
 0x102   : > { %2740 = vmatprep.subr.bf16.mxu0 %v4214_v26  ;;  %2863 = vmatprep.subr.bf16.mxu1 %v4216_v27  ;;  %v1101_v26 = vld [vmem:[%s5399_s16 + $0x720] sm:$0xff]  ;;  %v1098_v27 = vld [vmem:[%s5399_s16 + $0x708] sm:$0xff] }
 0x103   : > { %v4278_v32 = vcombine.high %v1097_v25, %v1101_v26  ;;  %v4277_v39 = vcombine.low %v1097_v25, %v1101_v26  ;;  %v4279_v40 = vcombine.low %v1098_v27, %v1102_v28  ;;  %v4718_v25 = vmov 0   ;;  %v1154_v26 = vld [vmem:[%s5399_s16 + $0x8c8] sm:$0xff] }
 0x105   : > { %2741 = vmatpush1.bf16.msra.mxu0 %v4213_v33  ;;  %2864 = vmatpush1.bf16.msra.mxu1 %v4215_v34  ;;  %v4280_v33 = vcombine.high %v1098_v27, %v1102_v28  ;;  %v1105_v34 = vld [vmem:[%s5399_s16 + $0x740] sm:$0xff]  ;;  %v1158_v27 = vld [vmem:[%s5399_s16 + $0x8e8] sm:$0xff] }
 0x106   : > { %2742 = vmatprep.subr.bf16.mxu0 %v4222_v36  ;;  %2865 = vmatprep.subr.bf16.mxu1 %v4224_v37  ;;  %v1109_v36 = vld [vmem:[%s5399_s16 + $0x760] sm:$0xff]  ;;  %v1106_v37 = vld [vmem:[%s5399_s16 + $0x748] sm:$0xff] }
 0x107   : > { %v4286_v41 = vcombine.high %v1105_v34, %v1109_v36  ;;  %v4285_v48 = vcombine.low %v1105_v34, %v1109_v36  ;;  %v4287_v49 = vcombine.low %v1106_v37, %v1110_v38  ;;  %v879_v34 = vld [vmem:[%s5399_s16 + $0x30] sm:$0xff]  ;;  %v876_v36 = vld [vmem:[%s5399_s16 + $0x18] sm:$0xff] }
 0x109   : > { %2743 = vmatpush1.bf16.msra.mxu0 %v4221_v42  ;;  %2866 = vmatpush1.bf16.msra.mxu1 %v4223_v43  ;;  %v4288_v42 = vcombine.high %v1106_v37, %v1110_v38  ;;  %v1113_v43 = vld [vmem:[%s5399_s16 + $0x780] sm:$0xff]  ;;  %v880_v37 = vld [vmem:[%s5399_s16 + $0x38] sm:$0xff] }
 0x10a   : > { %2744 = vmatprep.subr.bf16.mxu0 %v4230_v44  ;;  %2867 = vmatprep.subr.bf16.mxu1 %v4232_v45  ;;  %v1117_v44 = vld [vmem:[%s5399_s16 + $0x7a0] sm:$0xff]  ;;  %v1114_v45 = vld [vmem:[%s5399_s16 + $0x788] sm:$0xff] }
 0x10b   : > { %v4294_v50 = vcombine.high %v1113_v43, %v1117_v44  ;;  %v4293_v56 = vcombine.low %v1113_v43, %v1117_v44  ;;  %v4295_v58 = vcombine.low %v1114_v45, %v1118_v47  ;;  %v887_v43 = vld [vmem:[%s5399_s16 + $0x70] sm:$0xff]  ;;  %v884_v44 = vld [vmem:[%s5399_s16 + $0x58] sm:$0xff] }
 0x10d   : > { %2745 = vmatpush1.bf16.msra.mxu0 %v4229_v51  ;;  %2868 = vmatpush1.bf16.msra.mxu1 %v4231_v52  ;;  %v4296_v51 = vcombine.high %v1114_v45, %v1118_v47  ;;  %v1121_v52 = vld [vmem:[%s5399_s16 + $0x7c0] sm:$0xff]  ;;  %v888_v45 = vld [vmem:[%s5399_s16 + $0x78] sm:$0xff] }
 0x10e   : > { %2746 = vmatprep.subr.bf16.mxu0 %v4238_v53  ;;  %2869 = vmatprep.subr.bf16.mxu1 %v4240_v54  ;;  %v1125_v53 = vld [vmem:[%s5399_s16 + $0x7e0] sm:$0xff]  ;;  %v1122_v54 = vld [vmem:[%s5399_s16 + $0x7c8] sm:$0xff] }
 0x10f   : > { %v4302_v59 = vcombine.high %v1121_v52, %v1125_v53  ;;  %v4301_v2 = vcombine.low %v1121_v52, %v1125_v53  ;;  %v4303_v3 = vcombine.low %v1122_v54, %v1126_v55  ;;  %v895_v52 = vld [vmem:[%s5399_s16 + $0xb0] sm:$0xff]  ;;  %v892_v53 = vld [vmem:[%s5399_s16 + $0x98] sm:$0xff] }
 0x111   : > { %2747 = vmatpush1.bf16.msra.mxu0 %v4237_v60  ;;  %2870 = vmatpush1.bf16.msra.mxu1 %v4239_v62  ;;  %v4304_v60 = vcombine.high %v1122_v54, %v1126_v55  ;;  %v1129_v62 = vld [vmem:[%s5399_s16 + $0x800] sm:$0xff]  ;;  %v896_v54 = vld [vmem:[%s5399_s16 + $0xb8] sm:$0xff] }
 0x112   : > { %2748 = vmatprep.subr.bf16.mxu0 %v4246_v63  ;;  %2871 = vmatprep.subr.bf16.mxu1 %v4248_v0  ;;  %v1133_v63 = vld [vmem:[%s5399_s16 + $0x820] sm:$0xff]  ;;  %v1130_v0 = vld [vmem:[%s5399_s16 + $0x808] sm:$0xff] }
 0x113   : > { %v4310_v4 = vcombine.high %v1129_v62, %v1133_v63  ;;  %v4309_v11 = vcombine.low %v1129_v62, %v1133_v63  ;;  %v4311_v12 = vcombine.low %v1130_v0, %v1134_v1  ;;  %v903_v62 = vld [vmem:[%s5399_s16 + $0xf0] sm:$0xff]  ;;  %v900_v63 = vld [vmem:[%s5399_s16 + $0xd8] sm:$0xff] }
 0x115   : > { %2749 = vmatpush1.bf16.msra.mxu0 %v4245_v5  ;;  %2872 = vmatpush1.bf16.msra.mxu1 %v4247_v46  ;;  %v4312_v5 = vcombine.high %v1130_v0, %v1134_v1  ;;  %v1137_v46 = vld [vmem:[%s5399_s16 + $0x840] sm:$0xff]  ;;  %v904_v0 = vld [vmem:[%s5399_s16 + $0xf8] sm:$0xff] }
 0x116   : > { %2750 = vmatprep.subr.bf16.mxu0 %v4254_v57  ;;  %2873 = vmatprep.subr.bf16.mxu1 %v4256_v8  ;;  %v1141_v57 = vld [vmem:[%s5399_s16 + $0x860] sm:$0xff]  ;;  %v5569_v8 = vcombine.high %v5493_v61, %v5493_v61 }
 0x117   : > { %v4317_v19 = vcombine.low %v1137_v46, %v1141_v57 }
 0x119   : > { %2751 = vmatpush1.bf16.msra.mxu0 %v4253_v13  ;;  %2874 = vmatpush1.bf16.msra.mxu1 %v4255_v14  ;;  %v4318_v13 = vcombine.high %v1137_v46, %v1141_v57  ;;  %v4320_v14 = vcombine.high %v1138_v9, %v1142_v10  ;;  %v911_v46 = vld [vmem:[%s5399_s16 + $0x130] sm:$0xff]  ;;  %v908_v57 = vld [vmem:[%s5399_s16 + $0x118] sm:$0xff] }
 0x11a   : > { %2752 = vmatprep.subr.bf16.mxu0 %v4262_v15  ;;  %2875 = vmatprep.subr.bf16.mxu1 %v4264_v16  ;;  %v1145_v15 = vld [vmem:[%s5399_s16 + $0x880] sm:$0xff]  ;;  %v912_v9 = vld [vmem:[%s5399_s16 + $0x138] sm:$0xff] }
 0x11b   : > { %v1149_v16 = vld [vmem:[%s5399_s16 + $0x8a0] sm:$0xff] }
 0x11c   : > { %v4325_v28 = vcombine.low %v1145_v15, %v1149_v16 }
 0x11d   : > { %2753 = vmatpush1.bf16.msra.mxu0 %v4261_v21  ;;  %2876 = vmatpush1.bf16.msra.mxu1 %v4263_v22  ;;  %v4326_v21 = vcombine.high %v1145_v15, %v1149_v16  ;;  %v4328_v22 = vcombine.high %v1146_v17, %v1150_v18  ;;  %v916_v15 = vld [vmem:[%s5399_s16 + $0x158] sm:$0xff] }
 0x11e   : > { %2754 = vmatprep.subr.bf16.mxu0 %v4270_v23  ;;  %2877 = vmatprep.subr.bf16.mxu1 %v4272_v24  ;;  %v1153_v23 = vld [vmem:[%s5399_s16 + $0x8c0] sm:$0xff]  ;;  %v920_v16 = vld [vmem:[%s5399_s16 + $0x178] sm:$0xff] }
 0x11f   : > { %v1157_v24 = vld [vmem:[%s5399_s16 + $0x8e0] sm:$0xff] }
 0x120   : > { %v4333_v38 = vcombine.low %v1153_v23, %v1157_v24 }
 0x121   : > { %2755 = vmatpush1.bf16.msra.mxu0 %v4269_v29  ;;  %2878 = vmatpush1.bf16.msra.mxu1 %v4271_v31  ;;  %v4327_v29 = vcombine.low %v1146_v17, %v1150_v18  ;;  %v4334_v31 = vcombine.high %v1153_v23, %v1157_v24  ;;  %v4091_v18 = vcombine.low %v908_v57, %v912_v9  ;;  %v924_v23 = vld [vmem:[%s5399_s16 + $0x198] sm:$0xff] }
 0x122   : > { %2756 = vmatprep.subr.bf16.mxu0 %v4278_v32  ;;  %2879 = vmatprep.subr.bf16.mxu1 %v4280_v33  ;;  %v4336_v32 = vcombine.high %v1154_v26, %v1158_v27  ;;  %v875_v33 = vld [vmem:[%s5399_s16 + $0x10] sm:$0xff]  ;;  %v928_v24 = vld [vmem:[%s5399_s16 + $0x1b8] sm:$0xff] }
 0x123   : > { %v4057_v47 = vcombine.low %v875_v33, %v879_v34 }
 0x125   : > { %2757 = vmatpush1.bf16.msra.mxu0 %v4277_v39  ;;  %2880 = vmatpush1.bf16.msra.mxu1 %v4279_v40  ;;  %v4335_v39 = vcombine.low %v1154_v26, %v1158_v27  ;;  %v4058_v40 = vcombine.high %v875_v33, %v879_v34  ;;  %v4099_v27 = vcombine.low %v916_v15, %v920_v16  ;;  %v932_v33 = vld [vmem:[%s5399_s16 + $0x1d8] sm:$0xff] }
 0x126   : > { %2758 = vmatprep.subr.bf16.mxu0 %v4286_v41  ;;  %2881 = vmatprep.subr.bf16.mxu1 %v4288_v42  ;;  %v4060_v41 = vcombine.high %v876_v36, %v880_v37  ;;  %v883_v42 = vld [vmem:[%s5399_s16 + $0x50] sm:$0xff]  ;;  %v936_v34 = vld [vmem:[%s5399_s16 + $0x1f8] sm:$0xff] }
 0x127   : > { %v4065_v55 = vcombine.low %v883_v42, %v887_v43 }
 0x129   : > { %2759 = vmatpush1.bf16.msra.mxu0 %v4285_v48  ;;  %2882 = vmatpush1.bf16.msra.mxu1 %v4287_v49  ;;  %v4059_v48 = vcombine.low %v876_v36, %v880_v37  ;;  %v4066_v49 = vcombine.high %v883_v42, %v887_v43  ;;  %v4107_v37 = vcombine.low %v924_v23, %v928_v24  ;;  %v940_v42 = vld [vmem:[%s5399_s16 + $0x218] sm:$0xff] }
 0x12a   : > { %2760 = vmatprep.subr.bf16.mxu0 %v4294_v50  ;;  %2883 = vmatprep.subr.bf16.mxu1 %v4296_v51  ;;  %v4068_v50 = vcombine.high %v884_v44, %v888_v45  ;;  %v891_v51 = vld [vmem:[%s5399_s16 + $0x90] sm:$0xff]  ;;  %v944_v43 = vld [vmem:[%s5399_s16 + $0x238] sm:$0xff] }
 0x12b   : > { %v4073_v1 = vcombine.low %v891_v51, %v895_v52 }
 0x12d   : > { %2761 = vmatpush1.bf16.msra.mxu0 %v4293_v56  ;;  %2884 = vmatpush1.bf16.msra.mxu1 %v4295_v58  ;;  %v4067_v56 = vcombine.low %v884_v44, %v888_v45  ;;  %v4074_v58 = vcombine.high %v891_v51, %v895_v52  ;;  %v947_v45 = vld [vmem:[%s5399_s16 + $0x250] sm:$0xff]  ;;  %v948_v51 = vld [vmem:[%s5399_s16 + $0x258] sm:$0xff] }
 0x12e   : > { %2762 = vmatprep.subr.bf16.mxu0 %v4302_v59  ;;  %2885 = vmatprep.subr.bf16.mxu1 %v4304_v60  ;;  %v4076_v59 = vcombine.high %v892_v53, %v896_v54  ;;  %v899_v60 = vld [vmem:[%s5399_s16 + $0xd0] sm:$0xff]  ;;  %v952_v52 = vld [vmem:[%s5399_s16 + $0x278] sm:$0xff] }
 0x12f   : > { %v4081_v10 = vcombine.low %v899_v60, %v903_v62 }
 0x131   : > { %2763 = vmatpush1.bf16.msra.mxu0 %v4301_v2  ;;  %2886 = vmatpush1.bf16.msra.mxu1 %v4303_v3  ;;  %v4075_v2 = vcombine.low %v892_v53, %v896_v54  ;;  %v4082_v3 = vcombine.high %v899_v60, %v903_v62  ;;  %v955_v54 = vld [vmem:[%s5399_s16 + $0x290] sm:$0xff]  ;;  %v956_v60 = vld [vmem:[%s5399_s16 + $0x298] sm:$0xff] }
 0x132   : > { %2773 = vmatprep.subr.bf16.mxu0 %v4310_v4  ;;  %2896 = vmatprep.subr.bf16.mxu1 %v4312_v5  ;;  %v4084_v4 = vcombine.high %v900_v63, %v904_v0  ;;  %v907_v5 = vld [vmem:[%s5399_s16 + $0x110] sm:$0xff]  ;;  %v960_v62 = vld [vmem:[%s5399_s16 + $0x2b8] sm:$0xff] }
 0x133   : > { %v4089_v17 = vcombine.low %v907_v5, %v911_v46 }
 0x134   : > { %2765 = vmatmul.mubr.bf16.vlgmr.msra.gmra.mrb[0].mxu0 %v5569_v8  ;;  %2888 = vmatmul.mubr.bf16.vlgmr.msra.gmra.mrb[0].mxu1 %v5569_v8 }
 0x135   : > { %2774 = vmatpush1.bf16.msra.mxu0 %v4309_v11  ;;  %2897 = vmatpush1.bf16.msra.mxu1 %v4311_v12  ;;  %v4090_v11 = vcombine.high %v907_v5, %v911_v46  ;;  %v4092_v12 = vcombine.high %v908_v57, %v912_v9  ;;  %v964_v5 = vld [vmem:[%s5399_s16 + $0x2d8] sm:$0xff]  ;;  %v971_v9 = vld [vmem:[%s5399_s16 + $0x310] sm:$0xff] }
 0x136   : > { %2775 = vmatprep.subr.bf16.mxu0 %v4318_v13  ;;  %2898 = vmatprep.subr.bf16.mxu1 %v4320_v14  ;;  %v915_v13 = vld [vmem:[%s5399_s16 + $0x150] sm:$0xff]  ;;  %v968_v46 = vld [vmem:[%s5399_s16 + $0x2f8] sm:$0xff] }
 0x137   : > { %2805 = vmatprep.mubr.bf16.mxu0 %v4718_v25  ;;  %2928 = vmatprep.mubr.bf16.mxu1 %v4718_v25  ;;  %v919_v14 = vld [vmem:[%s5399_s16 + $0x170] sm:$0xff] }
 0x138   : > { %v4097_v26 = vcombine.low %v915_v13, %v919_v14 }
 0x139   : > { %2776 = vmatpush1.bf16.msra.mxu0 %v4317_v19  ;;  %2899 = vmatpush1.bf16.msra.mxu1 %v4319_v20  ;;  %v4098_v19 = vcombine.high %v915_v13, %v919_v14  ;;  %v4100_v20 = vcombine.high %v916_v15, %v920_v16  ;;  %v972_v13 = vld [vmem:[%s5399_s16 + $0x318] sm:$0xff]  ;;  %v979_v16 = vld [vmem:[%s5399_s16 + $0x350] sm:$0xff] }
 0x13a   : > { %2777 = vmatprep.subr.bf16.mxu0 %v4326_v21  ;;  %2900 = vmatprep.subr.bf16.mxu1 %v4328_v22  ;;  %v923_v21 = vld [vmem:[%s5399_s16 + $0x190] sm:$0xff]  ;;  %v976_v14 = vld [vmem:[%s5399_s16 + $0x338] sm:$0xff] }
 0x13b   : > { %v927_v22 = vld [vmem:[%s5399_s16 + $0x1b0] sm:$0xff] }
 0x13c   : > { %v4105_v36 = vcombine.low %v923_v21, %v927_v22 }
 0x13d   : > { %2778 = vmatpush1.bf16.msra.mxu0 %v4325_v28  ;;  %2901 = vmatpush1.bf16.msra.mxu1 %v4327_v29  ;;  %v4106_v28 = vcombine.high %v923_v21, %v927_v22  ;;  %v4108_v29 = vcombine.high %v924_v23, %v928_v24  ;;  %v980_v21 = vld [vmem:[%s5399_s16 + $0x358] sm:$0xff]  ;;  %v987_v24 = vld [vmem:[%s5399_s16 + $0x390] sm:$0xff] }
 0x13e   : > { %2779 = vmatprep.subr.bf16.mxu0 %v4334_v31  ;;  %2902 = vmatprep.subr.bf16.mxu1 %v4336_v32  ;;  %v931_v31 = vld [vmem:[%s5399_s16 + $0x1d0] sm:$0xff]  ;;  %v984_v22 = vld [vmem:[%s5399_s16 + $0x378] sm:$0xff] }
 0x13f   : > { %v935_v32 = vld [vmem:[%s5399_s16 + $0x1f0] sm:$0xff] }
 0x140   : > { %v4113_v44 = vcombine.low %v931_v31, %v935_v32 }
 0x141   : > { %2780 = vmatpush1.bf16.msra.mxu0 %v4333_v38  ;;  %2903 = vmatpush1.bf16.msra.mxu1 %v4335_v39  ;;  %v4114_v38 = vcombine.high %v931_v31, %v935_v32  ;;  %v4116_v39 = vcombine.high %v932_v33, %v936_v34  ;;  %v988_v31 = vld [vmem:[%s5399_s16 + $0x398] sm:$0xff] }
 0x142   : > { %2937 = vmatprep.subr.bf16.mxu0 %v4058_v40  ;;  %3060 = vmatprep.subr.bf16.mxu1 %v4060_v41  ;;  %v939_v40 = vld [vmem:[%s5399_s16 + $0x210] sm:$0xff]  ;;  %v992_v32 = vld [vmem:[%s5399_s16 + $0x3b8] sm:$0xff] }
 0x143   : > { %v943_v41 = vld [vmem:[%s5399_s16 + $0x230] sm:$0xff] }
 0x144   : > { %4341 = vmatmul.mubr.msk.bf16.vlgmr.msra.gmra.mrb[0].mxu0 %vm2687_vm0, %v5447_v30  ;;  %4342 = vmatmul.mubr.msk.bf16.vlgmr.msra.gmra.mrb[0].mxu1 %vm2687_vm0, %v5447_v30  ;;  %v4121_v53 = vcombine.low %v939_v40, %v943_v41 }
 0x145   : > { %2938 = vmatpush1.bf16.msra.mxu0 %v4057_v47  ;;  %3061 = vmatpush1.bf16.msra.mxu1 %v4059_v48  ;;  %v4115_v47 = vcombine.low %v932_v33, %v936_v34  ;;  %v4122_v48 = vcombine.high %v939_v40, %v943_v41  ;;  %v995_v34 = vld [vmem:[%s5399_s16 + $0x3d0] sm:$0xff]  ;;  %v1000_v40 = vld [vmem:[%s5399_s16 + $0x3f8] sm:$0xff]  ;;  %v4172_v41 = vcombine.high %v988_v31, %v992_v32 }
 0x146   : > { %2939 = vmatprep.subr.bf16.mxu0 %v4066_v49  ;;  %3062 = vmatprep.subr.bf16.mxu1 %v4068_v50  ;;  %v951_v49 = vld [vmem:[%s5399_s16 + $0x270] sm:$0xff]  ;;  %v4124_v50 = vcombine.high %v940_v42, %v944_v43 }
 0x147   : > { %2969 = vmatprep.mubr.bf16.mxu0 %v5427_v6  ;;  %3092 = vmatprep.mubr.bf16.mxu1 %v5427_v6  ;;  %v4083_v6 = vcombine.low %v900_v63, %v904_v0  ;;  %v4129_v63 = vcombine.low %v947_v45, %v951_v49  ;;  %v963_v0 = vld [vmem:[%s5399_s16 + $0x2d0] sm:$0xff] }
 0x149   : > { %2940 = vmatpush1.bf16.msra.mxu0 %v4065_v55  ;;  %3063 = vmatpush1.bf16.msra.mxu1 %v4067_v56  ;;  %v4123_v55 = vcombine.low %v940_v42, %v944_v43  ;;  %v4130_v56 = vcombine.high %v947_v45, %v951_v49  ;;  %v1003_v43 = vld [vmem:[%s5399_s16 + $0x410] sm:$0xff]  ;;  %v4171_v45 = vcombine.low %v988_v31, %v992_v32  ;;  %v1008_v49 = vld [vmem:[%s5399_s16 + $0x438] sm:$0xff] }
 0x14a   : > { %2941 = vmatprep.subr.bf16.mxu0 %v4074_v58  ;;  %3064 = vmatprep.subr.bf16.mxu1 %v4076_v59  ;;  %v959_v58 = vld [vmem:[%s5399_s16 + $0x2b0] sm:$0xff]  ;;  %v4132_v59 = vcombine.high %v948_v51, %v952_v52 }
 0x14b   : > { %v4137_v57 = vcombine.low %v955_v54, %v959_v58 }
 0x14d   : > { %2942 = vmatpush1.bf16.msra.mxu0 %v4073_v1  ;;  %3065 = vmatpush1.bf16.msra.mxu1 %v4075_v2  ;;  %v4131_v1 = vcombine.low %v948_v51, %v952_v52  ;;  %v4138_v2 = vcombine.high %v955_v54, %v959_v58  ;;  %v1011_v52 = vld [vmem:[%s5399_s16 + $0x450] sm:$0xff]  ;;  %v1016_v58 = vld [vmem:[%s5399_s16 + $0x478] sm:$0xff] }
 0x14e   : > { %2943 = vmatprep.subr.bf16.mxu0 %v4082_v3  ;;  %3066 = vmatprep.subr.bf16.mxu1 %v4084_v4  ;;  %v967_v3 = vld [vmem:[%s5399_s16 + $0x2f0] sm:$0xff]  ;;  %v4140_v4 = vcombine.high %v956_v60, %v960_v62 }
 0x14f   : > { %v4145_v15 = vcombine.low %v963_v0, %v967_v3 }
 0x151   : > { %2944 = vmatpush1.bf16.msra.mxu0 %v4081_v10  ;;  %3067 = vmatpush1.bf16.msra.mxu1 %v4083_v6  ;;  %v4139_v10 = vcombine.low %v956_v60, %v960_v62  ;;  %v4146_v6 = vcombine.high %v963_v0, %v967_v3  ;;  %v1019_v62 = vld [vmem:[%s5399_s16 + $0x490] sm:$0xff]  ;;  %v1024_v3 = vld [vmem:[%s5399_s16 + $0x4b8] sm:$0xff] }
 0x152   : > { %2945 = vmatprep.subr.bf16.mxu0 %v4090_v11  ;;  %3068 = vmatprep.subr.bf16.mxu1 %v4092_v12  ;;  %v975_v11 = vld [vmem:[%s5399_s16 + $0x330] sm:$0xff]  ;;  %v4148_v12 = vcombine.high %v964_v5, %v968_v46 }
 0x153   : > { %v4153_v23 = vcombine.low %v971_v9, %v975_v11 }
 0x155   : > { %2946 = vmatpush1.bf16.msra.mxu0 %v4089_v17  ;;  %3069 = vmatpush1.bf16.msra.mxu1 %v4091_v18  ;;  %v4147_v17 = vcombine.low %v964_v5, %v968_v46  ;;  %v4154_v18 = vcombine.high %v971_v9, %v975_v11  ;;  %v1027_v46 = vld [vmem:[%s5399_s16 + $0x4d0] sm:$0xff]  ;;  %v1032_v11 = vld [vmem:[%s5399_s16 + $0x4f8] sm:$0xff] }
 0x156   : > { %2947 = vmatprep.subr.bf16.mxu0 %v4098_v19  ;;  %3070 = vmatprep.subr.bf16.mxu1 %v4100_v20  ;;  %v983_v19 = vld [vmem:[%s5399_s16 + $0x370] sm:$0xff]  ;;  %v4156_v20 = vcombine.high %v972_v13, %v976_v14 }
 0x157   : > { %v4161_v33 = vcombine.low %v979_v16, %v983_v19 }
 0x159   : > { %2948 = vmatpush1.bf16.msra.mxu0 %v4097_v26  ;;  %3071 = vmatpush1.bf16.msra.mxu1 %v4099_v27  ;;  %v4155_v26 = vcombine.low %v972_v13, %v976_v14  ;;  %v4162_v27 = vcombine.high %v979_v16, %v983_v19  ;;  %v1035_v13 = vld [vmem:[%s5399_s16 + $0x510] sm:$0xff] }
 0x15a   : > { %2949 = vmatprep.subr.bf16.mxu0 %v4106_v28  ;;  %3072 = vmatprep.subr.bf16.mxu1 %v4108_v29  ;;  %v991_v28 = vld [vmem:[%s5399_s16 + $0x3b0] sm:$0xff]  ;;  %v4164_v29 = vcombine.high %v980_v21, %v984_v22 }
 0x15b   : > { %v4169_v42 = vcombine.low %v987_v24, %v991_v28  ;;  %v1039_v14 = vld [vmem:[%s5399_s16 + $0x530] sm:$0xff] }
 0x15d   : > { %2950 = vmatpush1.bf16.msra.mxu0 %v4105_v36  ;;  %3073 = vmatpush1.bf16.msra.mxu1 %v4107_v37  ;;  %v999_v36 = vld [vmem:[%s5399_s16 + $0x3f0] sm:$0xff]  ;;  %v4163_v37 = vcombine.low %v980_v21, %v984_v22  ;;  %v4218_v22 = vcombine.high %v1035_v13, %v1039_v14 }
 0x15e   : > { %2951 = vmatprep.subr.bf16.mxu0 %v4114_v38  ;;  %3074 = vmatprep.subr.bf16.mxu1 %v4116_v39  ;;  %v4170_v38 = vcombine.high %v987_v24, %v991_v28  ;;  %v996_v39 = vld [vmem:[%s5399_s16 + $0x3d8] sm:$0xff]  ;;  %v4177_v51 = vcombine.low %v995_v34, %v999_v36  ;;  %v1043_v21 = vld [vmem:[%s5399_s16 + $0x550] sm:$0xff]  ;;  %v4217_v28 = vcombine.low %v1035_v13, %v1039_v14 }
 0x15f   : > { %v4179_v54 = vcombine.low %v996_v39, %v1000_v40  ;;  %v1047_v24 = vld [vmem:[%s5399_s16 + $0x570] sm:$0xff]  ;;  %v1092_v14 = vld [vmem:[%s5399_s16 + $0x6d8] sm:$0xff] }
 0x160   : > { %v4226_v31 = vcombine.high %v1043_v21, %v1047_v24  ;;  %v1095_v13 = vld [vmem:[%s5399_s16 + $0x6f0] sm:$0xff] }
 0x161   : > { %2952 = vmatpush1.bf16.msra.mxu0 %v4113_v44  ;;  %3075 = vmatpush1.bf16.msra.mxu1 %v4115_v47  ;;  %v1007_v44 = vld [vmem:[%s5399_s16 + $0x430] sm:$0xff]  ;;  %v4178_v47 = vcombine.high %v995_v34, %v999_v36  ;;  %v1052_v36 = vld [vmem:[%s5399_s16 + $0x598] sm:$0xff] }
 0x162   : > { %2953 = vmatprep.subr.bf16.mxu0 %v4122_v48  ;;  %3076 = vmatprep.subr.bf16.mxu1 %v4124_v50  ;;  %v1004_v48 = vld [vmem:[%s5399_s16 + $0x418] sm:$0xff]  ;;  %v4180_v50 = vcombine.high %v996_v39, %v1000_v40  ;;  %v4185_v60 = vcombine.low %v1003_v43, %v1007_v44  ;;  %v1055_v34 = vld [vmem:[%s5399_s16 + $0x5b0] sm:$0xff] }
 0x163   : > { %v4187_v0 = vcombine.low %v1004_v48, %v1008_v49 }
 0x165   : > { %2954 = vmatpush1.bf16.msra.mxu0 %v4121_v53  ;;  %3077 = vmatpush1.bf16.msra.mxu1 %v4123_v55  ;;  %v1015_v53 = vld [vmem:[%s5399_s16 + $0x470] sm:$0xff]  ;;  %v4186_v55 = vcombine.high %v1003_v43, %v1007_v44  ;;  %v1060_v44 = vld [vmem:[%s5399_s16 + $0x5d8] sm:$0xff] }
 0x166   : > { %2955 = vmatprep.subr.bf16.mxu0 %v4130_v56  ;;  %3078 = vmatprep.subr.bf16.mxu1 %v4132_v59  ;;  %v1012_v56 = vld [vmem:[%s5399_s16 + $0x458] sm:$0xff]  ;;  %v4188_v59 = vcombine.high %v1004_v48, %v1008_v49  ;;  %v4193_v5 = vcombine.low %v1011_v52, %v1015_v53  ;;  %v1063_v43 = vld [vmem:[%s5399_s16 + $0x5f0] sm:$0xff] }
 0x167   : > { %v4195_v9 = vcombine.low %v1012_v56, %v1016_v58 }
 0x169   : > { %2956 = vmatpush1.bf16.msra.mxu0 %v4129_v63  ;;  %3079 = vmatpush1.bf16.msra.mxu1 %v4131_v1  ;;  %v1023_v63 = vld [vmem:[%s5399_s16 + $0x4b0] sm:$0xff]  ;;  %v4194_v1 = vcombine.high %v1011_v52, %v1015_v53  ;;  %v1068_v53 = vld [vmem:[%s5399_s16 + $0x618] sm:$0xff] }
 0x16a   : > { %2957 = vmatprep.subr.bf16.mxu0 %v4138_v2  ;;  %3080 = vmatprep.subr.bf16.mxu1 %v4140_v4  ;;  %v1020_v2 = vld [vmem:[%s5399_s16 + $0x498] sm:$0xff]  ;;  %v4196_v4 = vcombine.high %v1012_v56, %v1016_v58  ;;  %v1071_v52 = vld [vmem:[%s5399_s16 + $0x630] sm:$0xff] }
 0x16d   : > { %2958 = vmatpush1.bf16.msra.mxu0 %v4137_v57  ;;  %3081 = vmatpush1.bf16.msra.mxu1 %v4139_v10  ;;  %v1031_v57 = vld [vmem:[%s5399_s16 + $0x4f0] sm:$0xff]  ;;  %v4202_v10 = vcombine.high %v1019_v62, %v1023_v63 }
 0x16e   : > { %2959 = vmatprep.subr.bf16.mxu0 %v4146_v6  ;;  %3082 = vmatprep.subr.bf16.mxu1 %v4148_v12  ;;  %v1028_v6 = vld [vmem:[%s5399_s16 + $0x4d8] sm:$0xff]  ;;  %v4204_v12 = vcombine.high %v1020_v2, %v1024_v3  ;;  %v4210_v16 = vcombine.high %v1027_v46, %v1031_v57 }
 0x16f   : > { %v4212_v19 = vcombine.high %v1028_v6, %v1032_v11 }
 0x171   : > { %2960 = vmatpush1.bf16.msra.mxu0 %v4145_v15  ;;  %3083 = vmatpush1.bf16.msra.mxu1 %v4147_v17  ;;  %v4203_v15 = vcombine.low %v1020_v2, %v1024_v3  ;;  %v1036_v17 = vld [vmem:[%s5399_s16 + $0x518] sm:$0xff] }
 0x172   : > { %2961 = vmatprep.subr.bf16.mxu0 %v4154_v18  ;;  %3084 = vmatprep.subr.bf16.mxu1 %v4156_v20  ;;  %v1040_v18 = vld [vmem:[%s5399_s16 + $0x538] sm:$0xff]  ;;  %v4209_v20 = vcombine.low %v1027_v46, %v1031_v57  ;;  %v1087_v46 = vld [vmem:[%s5399_s16 + $0x6b0] sm:$0xff] }
 0x173   : > { %v1084_v57 = vld [vmem:[%s5399_s16 + $0x698] sm:$0xff] }
 0x175   : > { %2962 = vmatpush1.bf16.msra.mxu0 %v4153_v23  ;;  %3085 = vmatpush1.bf16.msra.mxu1 %v4155_v26  ;;  %v4220_v23 = vcombine.high %v1036_v17, %v1040_v18  ;;  %v1044_v26 = vld [vmem:[%s5399_s16 + $0x558] sm:$0xff] }
 0x176   : > { %2963 = vmatprep.subr.bf16.mxu0 %v4162_v27  ;;  %3086 = vmatprep.subr.bf16.mxu1 %v4164_v29  ;;  %v1048_v27 = vld [vmem:[%s5399_s16 + $0x578] sm:$0xff]  ;;  %v4219_v29 = vcombine.low %v1036_v17, %v1040_v18 }
 0x177   : > { %v4228_v32 = vcombine.high %v1044_v26, %v1048_v27  ;;  %v4227_v39 = vcombine.low %v1044_v26, %v1048_v27 }
 0x179   : > { %2964 = vmatpush1.bf16.msra.mxu0 %v4161_v33  ;;  %3087 = vmatpush1.bf16.msra.mxu1 %v4163_v37  ;;  %v1051_v33 = vld [vmem:[%s5399_s16 + $0x590] sm:$0xff]  ;;  %v1056_v37 = vld [vmem:[%s5399_s16 + $0x5b8] sm:$0xff] }
 0x17a   : > { %2965 = vmatprep.subr.bf16.mxu0 %v4170_v38  ;;  %3088 = vmatprep.subr.bf16.mxu1 %v4172_v41  ;;  %v4225_v38 = vcombine.low %v1043_v21, %v1047_v24  ;;  %v4234_v40 = vcombine.high %v1051_v33, %v1055_v34  ;;  %v4236_v41 = vcombine.high %v1052_v36, %v1056_v37  ;;  %v1103_v21 = vld [vmem:[%s5399_s16 + $0x730] sm:$0xff] }
 0x17b   : > { %v4235_v48 = vcombine.low %v1052_v36, %v1056_v37 }
 0x17d   : > { %2966 = vmatpush1.bf16.msra.mxu0 %v4169_v42  ;;  %3089 = vmatpush1.bf16.msra.mxu1 %v4171_v45  ;;  %v1059_v42 = vld [vmem:[%s5399_s16 + $0x5d0] sm:$0xff]  ;;  %v1064_v45 = vld [vmem:[%s5399_s16 + $0x5f8] sm:$0xff] }
 0x17e   : > { %2967 = vmatprep.subr.bf16.mxu0 %v4178_v47  ;;  %3090 = vmatprep.subr.bf16.mxu1 %v4180_v50  ;;  %v4233_v47 = vcombine.low %v1051_v33, %v1055_v34  ;;  %v4242_v49 = vcombine.high %v1059_v42, %v1063_v43  ;;  %v4244_v50 = vcombine.high %v1060_v44, %v1064_v45 }
 0x17f   : > { %v4243_v56 = vcombine.low %v1060_v44, %v1064_v45 }
 0x181   : > { %2968 = vmatpush1.bf16.msra.mxu0 %v4177_v51  ;;  %3091 = vmatpush1.bf16.msra.mxu1 %v4179_v54  ;;  %v1067_v51 = vld [vmem:[%s5399_s16 + $0x610] sm:$0xff]  ;;  %v1072_v54 = vld [vmem:[%s5399_s16 + $0x638] sm:$0xff] }
 0x182   : > { %2978 = vmatprep.subr.bf16.mxu0 %v4186_v55  ;;  %3101 = vmatprep.subr.bf16.mxu1 %v4188_v59  ;;  %v4241_v55 = vcombine.low %v1059_v42, %v1063_v43  ;;  %v4250_v58 = vcombine.high %v1067_v51, %v1071_v52  ;;  %v4252_v59 = vcombine.high %v1068_v53, %v1072_v54 }
 0x183   : > { %v4251_v2 = vcombine.low %v1068_v53, %v1072_v54 }
 0x184   : > { %2970 = vmatmul.mubr.bf16.vlgmr.msra.gmra.mrb[4].mxu0 %v5493_v61  ;;  %3093 = vmatmul.mubr.bf16.vlgmr.msra.gmra.mrb[4].mxu1 %v5493_v61  ;;  %v4201_v61 = vcombine.low %v1019_v62, %v1023_v63  ;;  %v1079_v62 = vld [vmem:[%s5399_s16 + $0x670] sm:$0xff]  ;;  %v1076_v63 = vld [vmem:[%s5399_s16 + $0x658] sm:$0xff] }
 0x185   : > { %2979 = vmatpush1.bf16.msra.mxu0 %v4185_v60  ;;  %3102 = vmatpush1.bf16.msra.mxu1 %v4187_v0  ;;  %v1075_v60 = vld [vmem:[%s5399_s16 + $0x650] sm:$0xff]  ;;  %v1080_v0 = vld [vmem:[%s5399_s16 + $0x678] sm:$0xff] }
 0x186   : > { %2980 = vmatprep.subr.bf16.mxu0 %v4194_v1  ;;  %3103 = vmatprep.subr.bf16.mxu1 %v4196_v4  ;;  %v4249_v1 = vcombine.low %v1067_v51, %v1071_v52  ;;  %v4258_v3 = vcombine.high %v1075_v60, %v1079_v62  ;;  %v4260_v4 = vcombine.high %v1076_v63, %v1080_v0 }
 0x187   : > { %3010 = vmatprep.mubr.bf16.mxu0 %v5501_v7  ;;  %3133 = vmatprep.mubr.bf16.mxu1 %v5501_v7  ;;  %v4211_v7 = vcombine.low %v1028_v6, %v1032_v11  ;;  %v4259_v6 = vcombine.low %v1076_v63, %v1080_v0 }
 0x189   : > { %2981 = vmatpush1.bf16.msra.mxu0 %v4193_v5  ;;  %3104 = vmatpush1.bf16.msra.mxu1 %v4195_v9  ;;  %v1083_v5 = vld [vmem:[%s5399_s16 + $0x690] sm:$0xff]  ;;  %v1088_v9 = vld [vmem:[%s5399_s16 + $0x6b8] sm:$0xff] }
 0x18a   : > { %2982 = vmatprep.subr.bf16.mxu0 %v4202_v10  ;;  %3105 = vmatprep.subr.bf16.mxu1 %v4204_v12  ;;  %v4257_v10 = vcombine.low %v1075_v60, %v1079_v62  ;;  %v4266_v11 = vcombine.high %v1083_v5, %v1087_v46  ;;  %v4268_v12 = vcombine.high %v1084_v57, %v1088_v9 }
 0x18b   : > { %v4267_v17 = vcombine.low %v1084_v57, %v1088_v9 }
 0x18d   : > { %2983 = vmatpush1.bf16.msra.mxu0 %v4201_v61  ;;  %3106 = vmatpush1.bf16.msra.mxu1 %v4203_v15  ;;  %v1091_v61 = vld [vmem:[%s5399_s16 + $0x6d0] sm:$0xff]  ;;  %v1096_v15 = vld [vmem:[%s5399_s16 + $0x6f8] sm:$0xff] }
 0x18e   : > { %2984 = vmatprep.subr.bf16.mxu0 %v4210_v16  ;;  %3107 = vmatprep.subr.bf16.mxu1 %v4212_v19  ;;  %v4265_v16 = vcombine.low %v1083_v5, %v1087_v46  ;;  %v4274_v18 = vcombine.high %v1091_v61, %v1095_v13  ;;  %v4276_v19 = vcombine.high %v1092_v14, %v1096_v15 }
 0x18f   : > { %v4275_v24 = vcombine.low %v1092_v14, %v1096_v15 }
 0x191   : > { %2985 = vmatpush1.bf16.msra.mxu0 %v4209_v20  ;;  %3108 = vmatpush1.bf16.msra.mxu1 %v4211_v7  ;;  %v1099_v20 = vld [vmem:[%s5399_s16 + $0x710] sm:$0xff]  ;;  %v1100_v7 = vld [vmem:[%s5399_s16 + $0x718] sm:$0xff] }
 0x192   : > { %2986 = vmatprep.subr.bf16.mxu0 %v4218_v22  ;;  %3109 = vmatprep.subr.bf16.mxu1 %v4220_v23  ;;  %v1104_v22 = vld [vmem:[%s5399_s16 + $0x738] sm:$0xff]  ;;  %v4273_v23 = vcombine.low %v1091_v61, %v1095_v13  ;;  %v4282_v26 = vcombine.high %v1099_v20, %v1103_v21  ;;  %v4281_v33 = vcombine.low %v1099_v20, %v1103_v21 }
 0x193   : > { %v4284_v27 = vcombine.high %v1100_v7, %v1104_v22  ;;  %v4283_v34 = vcombine.low %v1100_v7, %v1104_v22 }
 0x195   : > { %2987 = vmatpush1.bf16.msra.mxu0 %v4217_v28  ;;  %3110 = vmatpush1.bf16.msra.mxu1 %v4219_v29  ;;  %v1107_v28 = vld [vmem:[%s5399_s16 + $0x750] sm:$0xff] }
 0x196   : > { %2988 = vmatprep.subr.bf16.mxu0 %v4226_v31  ;;  %3111 = vmatprep.subr.bf16.mxu1 %v4228_v32  ;;  %v1111_v29 = vld [vmem:[%s5399_s16 + $0x770] sm:$0xff]  ;;  %v1108_v31 = vld [vmem:[%s5399_s16 + $0x758] sm:$0xff] }
 0x197   : > { %v1112_v32 = vld [vmem:[%s5399_s16 + $0x778] sm:$0xff]  ;;  %v4290_v36 = vcombine.high %v1107_v28, %v1111_v29  ;;  %v4289_v42 = vcombine.low %v1107_v28, %v1111_v29  ;;  %v4593_v28 = vld [vmem:[%s5630_s30 + $0x48] sm:$0xff]  }
 0x198   : > { %v4292_v37 = vcombine.high %v1108_v31, %v1112_v32  ;;  %v4291_v43 = vcombine.low %v1108_v31, %v1112_v32  ;;  %v4594_v29 = vld [vmem:[%s5630_s30 + $0xc8] sm:$0xff]  }
 0x199   : > { %2989 = vmatpush1.bf16.msra.mxu0 %v4225_v38  ;;  %3112 = vmatpush1.bf16.msra.mxu1 %v4227_v39  ;;  %v1115_v38 = vld [vmem:[%s5399_s16 + $0x790] sm:$0xff]  ;;  %v4595_v31 = vld [vmem:[%s5630_s30 + $0x8] sm:$0xff]  }
 0x19a   : > { %2990 = vmatprep.subr.bf16.mxu0 %v4234_v40  ;;  %3113 = vmatprep.subr.bf16.mxu1 %v4236_v41  ;;  %v1119_v39 = vld [vmem:[%s5399_s16 + $0x7b0] sm:$0xff]  ;;  %v1116_v40 = vld [vmem:[%s5399_s16 + $0x798] sm:$0xff]  ;;  %v4596_v32 = vld [vmem:[%s5630_s30 + $0x88] sm:$0xff]  }
 0x19b   : > { %v1120_v41 = vld [vmem:[%s5399_s16 + $0x7b8] sm:$0xff]  ;;  %v4298_v44 = vcombine.high %v1115_v38, %v1119_v39  ;;  %v4297_v51 = vcombine.low %v1115_v38, %v1119_v39 }
 0x19c   : > { %v4300_v45 = vcombine.high %v1116_v40, %v1120_v41  ;;  %v4299_v52 = vcombine.low %v1116_v40, %v1120_v41  ;;  %v4602_v38 = vld [vmem:[%s5630_s30 + $0xd8] sm:$0xff]   ;;  %v4605_v41 = vld [vmem:[%s5630_s30 + $0x60] sm:$0xff]  }
 0x19d   : > { %2991 = vmatpush1.bf16.msra.mxu0 %v4233_v47  ;;  %3114 = vmatpush1.bf16.msra.mxu1 %v4235_v48  ;;  %v1123_v47 = vld [vmem:[%s5399_s16 + $0x7d0] sm:$0xff]  ;;  %v4603_v39 = vld [vmem:[%s5630_s30 + $0x18] sm:$0xff]  }
 0x19e   : > { %2992 = vmatprep.subr.bf16.mxu0 %v4242_v49  ;;  %3115 = vmatprep.subr.bf16.mxu1 %v4244_v50  ;;  %v1127_v48 = vld [vmem:[%s5399_s16 + $0x7f0] sm:$0xff]  ;;  %v1124_v49 = vld [vmem:[%s5399_s16 + $0x7d8] sm:$0xff] }
 0x19f   : > { %v1128_v50 = vld [vmem:[%s5399_s16 + $0x7f8] sm:$0xff]  ;;  %v4306_v53 = vcombine.high %v1123_v47, %v1127_v48  ;;  %v4305_v60 = vcombine.low %v1123_v47, %v1127_v48  ;;  %v4610_v47 = vld [vmem:[%s5630_s30 + $0xe8] sm:$0xff]  }
 0x1a0   : > { %v4308_v54 = vcombine.high %v1124_v49, %v1128_v50  ;;  %v4307_v62 = vcombine.low %v1124_v49, %v1128_v50  ;;  %v4604_v40 = vld [vmem:[%s5630_s30 + $0x98] sm:$0xff]   ;;  %v4611_v48 = vld [vmem:[%s5630_s30 + $0x28] sm:$0xff]   ;;  %v4613_v50 = vld [vmem:[%s5630_s30 + $0x70] sm:$0xff]  }
 0x1a1   : > { %2993 = vmatpush1.bf16.msra.mxu0 %v4241_v55  ;;  %3116 = vmatpush1.bf16.msra.mxu1 %v4243_v56  ;;  %v1131_v55 = vld [vmem:[%s5399_s16 + $0x810] sm:$0xff]  ;;  %v4612_v49 = vld [vmem:[%s5630_s30 + $0xa8] sm:$0xff]  }
 0x1a2   : > { %2994 = vmatprep.subr.bf16.mxu0 %v4250_v58  ;;  %3117 = vmatprep.subr.bf16.mxu1 %v4252_v59  ;;  %v1135_v56 = vld [vmem:[%s5399_s16 + $0x830] sm:$0xff]  ;;  %v1132_v58 = vld [vmem:[%s5399_s16 + $0x818] sm:$0xff] }
 0x1a3   : > { %v1136_v59 = vld [vmem:[%s5399_s16 + $0x838] sm:$0xff]  ;;  %v4314_v63 = vcombine.high %v1131_v55, %v1135_v56  ;;  %v4313_v5 = vcombine.low %v1131_v55, %v1135_v56 }
 0x1a4   : > { %v4316_v0 = vcombine.high %v1132_v58, %v1136_v59  ;;  %v4315_v46 = vcombine.low %v1132_v58, %v1136_v59  ;;  %v4618_v55 = vld [vmem:[%s5630_s30 + $0xf8] sm:$0xff]   ;;  %v4621_v59 = vld [vmem:[%s5630_s30 + $0x140] sm:$0xff]  }
 0x1a5   : > { %2995 = vmatpush1.bf16.msra.mxu0 %v4249_v1  ;;  %3118 = vmatpush1.bf16.msra.mxu1 %v4251_v2  ;;  %v1139_v1 = vld [vmem:[%s5399_s16 + $0x850] sm:$0xff]  ;;  %v4619_v56 = vld [vmem:[%s5630_s30 + $0x38] sm:$0xff]  }
 0x1a6   : > { %2996 = vmatprep.subr.bf16.mxu0 %v4258_v3  ;;  %3119 = vmatprep.subr.bf16.mxu1 %v4260_v4  ;;  %v1143_v2 = vld [vmem:[%s5399_s16 + $0x870] sm:$0xff]  ;;  %v1140_v3 = vld [vmem:[%s5399_s16 + $0x858] sm:$0xff] }
 0x1a7   : > { %v1144_v4 = vld [vmem:[%s5399_s16 + $0x878] sm:$0xff]  ;;  %v4322_v57 = vcombine.high %v1139_v1, %v1143_v2  ;;  %v4321_v61 = vcombine.low %v1139_v1, %v1143_v2  ;;  %v1169_v1 = vsub.s32 1, %v5392_v35  ;;  %v4719_v2 = vmov 1983009808  }
 0x1a8   : > { %v4324_v9 = vcombine.high %v1140_v3, %v1144_v4  ;;  %v4323_v13 = vcombine.low %v1140_v3, %v1144_v4  ;;  %v4620_v58 = vld [vmem:[%s5630_s30 + $0xb8] sm:$0xff]   ;;  %v3194_v3 = vunpack.c.l.s4 %v4719_v2  ;;  %v1177_v4 = vsub.s32 3, %v5392_v35 }
 0x1a9   : > { %2997 = vmatpush1.bf16.msra.mxu0 %v4257_v10  ;;  %3120 = vmatpush1.bf16.msra.mxu1 %v4259_v6  ;;  %v1147_v10 = vld [vmem:[%s5399_s16 + $0x890] sm:$0xff]  ;;  %v1185_v2 = vsub.s32 5, %v5392_v35 }
 0x1aa   : > { %2998 = vmatprep.subr.bf16.mxu0 %v4266_v11  ;;  %3121 = vmatprep.subr.bf16.mxu1 %v4268_v12  ;;  %v1151_v6 = vld [vmem:[%s5399_s16 + $0x8b0] sm:$0xff]  ;;  %v1148_v11 = vld [vmem:[%s5399_s16 + $0x898] sm:$0xff] }
 0x1ab   : > { %v1152_v12 = vld [vmem:[%s5399_s16 + $0x8b8] sm:$0xff]  ;;  %v4330_v14 = vcombine.high %v1147_v10, %v1151_v6  ;;  %v4329_v20 = vcombine.low %v1147_v10, %v1151_v6 }
 0x1ac   : > { %v4332_v15 = vcombine.high %v1148_v11, %v1152_v12 }
 0x1ad   : > { %2999 = vmatpush1.bf16.msra.mxu0 %v4265_v16  ;;  %3122 = vmatpush1.bf16.msra.mxu1 %v4267_v17  ;;  %v1155_v16 = vld [vmem:[%s5399_s16 + $0x8d0] sm:$0xff] }
 0x1ae   : > { %3000 = vmatprep.subr.bf16.mxu0 %v4274_v18  ;;  %3123 = vmatprep.subr.bf16.mxu1 %v4276_v19  ;;  %v1159_v17 = vld [vmem:[%s5399_s16 + $0x8f0] sm:$0xff]  ;;  %v1156_v18 = vld [vmem:[%s5399_s16 + $0x8d8] sm:$0xff] }
 0x1af   : > { %v1160_v19 = vld [vmem:[%s5399_s16 + $0x8f8] sm:$0xff]  ;;  %v4338_v21 = vcombine.high %v1155_v16, %v1159_v17  ;;  %v4337_v22 = vcombine.low %v1155_v16, %v1159_v17  ;;  %s5855_s16 = scalar_lea.hbm %s5903_s4, %s4415_s13 }
 0x1b0   : > { %v4340_v7 = vcombine.high %v1156_v18, %v1160_v19 }
 0x1b1   : > { %3001 = vmatpush1.bf16.msra.mxu0 %v4273_v23  ;;  %3124 = vmatpush1.bf16.msra.mxu1 %v4275_v24  ;;  %v4339_v23 = vcombine.low %v1156_v18, %v1160_v19  ;;  %v4590_v24 = vld [vmem:[%s5630_s30 + $0xc0] sm:$0xff]  }
 0x1b2   : > { %3002 = vmatprep.subr.bf16.mxu0 %v4282_v26  ;;  %3125 = vmatprep.subr.bf16.mxu1 %v4284_v27  ;;  %v4591_v26 = vld [vmem:[%s5630_s30] sm:$0xff]  }
 0x1b3   : > { %v4592_v27 = vld [vmem:[%s5630_s30 + $0x80] sm:$0xff]  }
 0x1b5   : > { %3003 = vmatpush1.bf16.msra.mxu0 %v4281_v33  ;;  %3126 = vmatpush1.bf16.msra.mxu1 %v4283_v34  ;;  %v4597_v33 = vld [vmem:[%s5630_s30 + $0x50] sm:$0xff]  }
 0x1b6   : > { %3004 = vmatprep.subr.bf16.mxu0 %v4290_v36  ;;  %3127 = vmatprep.subr.bf16.mxu1 %v4292_v37  ;;  %v4598_v34 = vld [vmem:[%s5630_s30 + $0xd0] sm:$0xff]  }
 0x1b7   : > { %v4599_v36 = vld [vmem:[%s5630_s30 + $0x10] sm:$0xff]  }
 0x1b8   : > { %v4600_v37 = vld [vmem:[%s5630_s30 + $0x90] sm:$0xff]  }
 0x1b9   : > { %3005 = vmatpush1.bf16.msra.mxu0 %v4289_v42  ;;  %3128 = vmatpush1.bf16.msra.mxu1 %v4291_v43  ;;  %v4606_v42 = vld [vmem:[%s5630_s30 + $0xe0] sm:$0xff]  }
 0x1ba   : > { %3006 = vmatprep.subr.bf16.mxu0 %v4298_v44  ;;  %3129 = vmatprep.subr.bf16.mxu1 %v4300_v45  ;;  %v4607_v43 = vld [vmem:[%s5630_s30 + $0x20] sm:$0xff]   ;;  %v4609_v45 = vld [vmem:[%s5630_s30 + $0x68] sm:$0xff]  }
 0x1bb   : > { %v4608_v44 = vld [vmem:[%s5630_s30 + $0xa0] sm:$0xff]  }
 0x1bd   : > { %3007 = vmatpush1.bf16.msra.mxu0 %v4297_v51  ;;  %3130 = vmatpush1.bf16.msra.mxu1 %v4299_v52  ;;  %v4614_v51 = vld [vmem:[%s5630_s30 + $0xf0] sm:$0xff]  }
 0x1be   : > { %3008 = vmatprep.subr.bf16.mxu0 %v4306_v53  ;;  %3131 = vmatprep.subr.bf16.mxu1 %v4308_v54  ;;  %v4615_v52 = vld [vmem:[%s5630_s30 + $0x30] sm:$0xff]   ;;  %v4617_v54 = vld [vmem:[%s5630_s30 + $0x78] sm:$0xff]  }
 0x1bf   : > { %v4616_v53 = vld [vmem:[%s5630_s30 + $0xb0] sm:$0xff]  }
 0x1c1   : > { %3009 = vmatpush1.bf16.msra.mxu0 %v4305_v60  ;;  %3132 = vmatpush1.bf16.msra.mxu1 %v4307_v62  ;;  %v4622_v60 = vld [vmem:[%s5630_s30 + $0x1c0] sm:$0xff]   ;;  %v1165_v62 = vsub.s32 0, %v5392_v35 }
 0x1c2   : > { %3019 = vmatprep.subr.bf16.mxu0 %v4314_v63  ;;  %3142 = vmatprep.subr.bf16.mxu1 %v4316_v0  ;;  %v5792_v63 = vld [vmem:[%s858_s9] sm:$0xff]  ;;  %v1173_v0 = vsub.s32 2, %v5392_v35 }
 0x1c3   : > { %v1178_v10 = vrot.slane %v5792_v63, %v1177_v4 }
 0x1c4   : > { %3011 = vmatmul.mubr.bf16.vlgmr.msra.gmra.mrb[4].mxu0 %v5569_v8  ;;  %3134 = vmatmul.mubr.bf16.vlgmr.msra.gmra.mrb[4].mxu1 %v5569_v8  ;;  %v4331_v8 = vcombine.low %v1148_v11, %v1152_v12 }
 0x1c5   : > { %3020 = vmatpush1.bf16.msra.mxu0 %v4313_v5  ;;  %3143 = vmatpush1.bf16.msra.mxu1 %v4315_v46  ;;  %v1166_v5 = vrot.slane %v5792_v63, %v1165_v62  ;;  %v1174_v46 = vrot.slane %v5792_v63, %v1173_v0  ;;  %v4652_v62 = vld [vmem:[%s5630_s30 + $0x1b8] sm:$0xff]   ;;  %v1181_v0 = vsub.s32 4, %v5392_v35 }
 0x1c6   : > { %3021 = vmatprep.subr.bf16.mxu0 %v4322_v57  ;;  %3144 = vmatprep.subr.bf16.mxu1 %v4324_v9  ;;  %v1170_v57 = vrot.slane %v5792_v63, %v1169_v1  ;;  %v3195_v9 = vunpack.c.0.s8 %v3194_v3  ;;  %v1189_v1 = vsub.s32 6, %v5392_v35  ;;  %v1193_v3 = vsub.s32 7, %v5392_v35 }
 0x1c7   : > { %3051 = vmatprep.mubr.bf16.mxu0 %v4718_v25  ;;  %3174 = vmatprep.mubr.bf16.mxu1 %v4718_v25  ;;  %v4589_v25 = vld [vmem:[%s5630_s30 + $0x40] sm:$0xff]   ;;  %v1182_v4 = vrot.slane %v5792_v63, %v1181_v0 }
 0x1c9   : > { %3022 = vmatpush1.bf16.msra.mxu0 %v4321_v61  ;;  %3145 = vmatpush1.bf16.msra.mxu1 %v4323_v13 }
 0x1ca   : > { %3023 = vmatprep.subr.bf16.mxu0 %v4330_v14  ;;  %3146 = vmatprep.subr.bf16.mxu1 %v4332_v15  ;;  %v5802_v15 = vsub.s32 %v3195_v9, %v5392_v35 }
 0x1cd   : > { %3024 = vmatpush1.bf16.msra.mxu0 %v4329_v20  ;;  %3147 = vmatpush1.bf16.msra.mxu1 %v4331_v8 }
 0x1ce   : > { %3025 = vmatprep.subr.bf16.mxu0 %v4338_v21  ;;  %3148 = vmatprep.subr.bf16.mxu1 %v4340_v7 }
 0x1d1   : > { %3026 = vmatpush1.bf16.msra.mxu0 %v4337_v22  ;;  %3149 = vmatpush1.bf16.msra.mxu1 %v4339_v23  ;;  %v4623_v22 = vld [vmem:[%s5630_s30 + $0x100] sm:$0xff]  }
 0x1d2   : > { %4416 = vmatprep.subr.bf16.mxu0 %v4589_v25  ;;  %4438 = vmatprep.subr.bf16.mxu1 %v4590_v24 }
 0x1d4   : > { %4343 = vmatmul.mubr.msk.bf16.vlgmr.msra.gmra.mrb[4].mxu0 %vm2687_vm0, %v5447_v30  ;;  %4344 = vmatmul.mubr.msk.bf16.vlgmr.msra.gmra.mrb[4].mxu1 %vm2687_vm0, %v5447_v30  ;;  %v4601_v30 = vld [vmem:[%s5630_s30 + $0x58] sm:$0xff]  }
 0x1d5   : > { %4417 = vmatpush3.bf16.msra.mxu0 %v4591_v26  ;;  %4439 = vmatpush3.bf16.msra.mxu1 %v4592_v27  ;;  %v4624_v26 = vld [vmem:[%s5630_s30 + $0x180] sm:$0xff]   ;;  %v4625_v27 = vld [vmem:[%s5630_s30 + $0x148] sm:$0xff]  }
 0x1d6   : > { %4418 = vmatprep.subr.bf16.mxu0 %v4593_v28  ;;  %4440 = vmatprep.subr.bf16.mxu1 %v4594_v29 }
 0x1d9   : > { %4419 = vmatpush3.bf16.msra.mxu0 %v4595_v31  ;;  %4441 = vmatpush3.bf16.msra.mxu1 %v4596_v32  ;;  %v4626_v31 = vld [vmem:[%s5630_s30 + $0x1c8] sm:$0xff]  }
 0x1da   : > { %4420 = vmatprep.subr.bf16.mxu0 %v4597_v33  ;;  %4442 = vmatprep.subr.bf16.mxu1 %v4598_v34  ;;  %v4627_v33 = vld [vmem:[%s5630_s30 + $0x108] sm:$0xff]  }
 0x1dd   : > { %4421 = vmatpush3.bf16.msra.mxu0 %v4599_v36  ;;  %4443 = vmatpush3.bf16.msra.mxu1 %v4600_v37  ;;  %v4628_v36 = vld [vmem:[%s5630_s30 + $0x188] sm:$0xff]   ;;  %v4629_v37 = vld [vmem:[%s5630_s30 + $0x150] sm:$0xff]  }
 0x1de   : > { %4422 = vmatprep.subr.bf16.mxu0 %v4601_v30  ;;  %4444 = vmatprep.subr.bf16.mxu1 %v4602_v38  ;;  %v4630_v30 = vld [vmem:[%s5630_s30 + $0x1d0] sm:$0xff]  }
 0x1df   : > { %v4631_v38 = vld [vmem:[%s5630_s30 + $0x110] sm:$0xff]  }
 0x1e1   : > { %4423 = vmatpush3.bf16.msra.mxu0 %v4603_v39  ;;  %4445 = vmatpush3.bf16.msra.mxu1 %v4604_v40  ;;  %v4632_v39 = vld [vmem:[%s5630_s30 + $0x190] sm:$0xff]   ;;  %v4633_v40 = vld [vmem:[%s5630_s30 + $0x158] sm:$0xff]  }
 0x1e2   : > { %4424 = vmatprep.subr.bf16.mxu0 %v4605_v41  ;;  %4446 = vmatprep.subr.bf16.mxu1 %v4606_v42  ;;  %v4634_v41 = vld [vmem:[%s5630_s30 + $0x1d8] sm:$0xff]  }
 0x1e3   : > { %v4635_v42 = vld [vmem:[%s5630_s30 + $0x118] sm:$0xff]  }
 0x1e5   : > { %4425 = vmatpush3.bf16.msra.mxu0 %v4607_v43  ;;  %4447 = vmatpush3.bf16.msra.mxu1 %v4608_v44  ;;  %v4636_v43 = vld [vmem:[%s5630_s30 + $0x198] sm:$0xff]   ;;  %v4637_v44 = vld [vmem:[%s5630_s30 + $0x160] sm:$0xff]  }
 0x1e6   : > { %4426 = vmatprep.subr.bf16.mxu0 %v4609_v45  ;;  %4448 = vmatprep.subr.bf16.mxu1 %v4610_v47  ;;  %v4638_v45 = vld [vmem:[%s5630_s30 + $0x1e0] sm:$0xff]  }
 0x1e7   : > { %v4639_v47 = vld [vmem:[%s5630_s30 + $0x120] sm:$0xff]  }
 0x1e9   : > { %4427 = vmatpush3.bf16.msra.mxu0 %v4611_v48  ;;  %4449 = vmatpush3.bf16.msra.mxu1 %v4612_v49  ;;  %v4640_v48 = vld [vmem:[%s5630_s30 + $0x1a0] sm:$0xff]   ;;  %v4641_v49 = vld [vmem:[%s5630_s30 + $0x168] sm:$0xff]  }
 0x1ea   : > { %4428 = vmatprep.subr.bf16.mxu0 %v4613_v50  ;;  %4450 = vmatprep.subr.bf16.mxu1 %v4614_v51  ;;  %v4642_v50 = vld [vmem:[%s5630_s30 + $0x1e8] sm:$0xff]  }
 0x1eb   : > { %v4643_v51 = vld [vmem:[%s5630_s30 + $0x128] sm:$0xff]  }
 0x1ed   : > { %4429 = vmatpush3.bf16.msra.mxu0 %v4615_v52  ;;  %4451 = vmatpush3.bf16.msra.mxu1 %v4616_v53  ;;  %v4644_v52 = vld [vmem:[%s5630_s30 + $0x1a8] sm:$0xff]   ;;  %v4645_v53 = vld [vmem:[%s5630_s30 + $0x170] sm:$0xff]  }
 0x1ee   : > { %4430 = vmatprep.subr.bf16.mxu0 %v4617_v54  ;;  %4452 = vmatprep.subr.bf16.mxu1 %v4618_v55  ;;  %v4646_v54 = vld [vmem:[%s5630_s30 + $0x1f0] sm:$0xff]  }
 0x1ef   : > { %v4647_v55 = vld [vmem:[%s5630_s30 + $0x130] sm:$0xff]  }
 0x1f1   : > { %4431 = vmatpush3.bf16.msra.mxu0 %v4619_v56  ;;  %4453 = vmatpush3.bf16.msra.mxu1 %v4620_v58  ;;  %v4648_v56 = vld [vmem:[%s5630_s30 + $0x1b0] sm:$0xff]   ;;  %v4649_v58 = vld [vmem:[%s5630_s30 + $0x178] sm:$0xff]  }
 0x1f2   : > { %4460 = vmatprep.subr.bf16.mxu0 %v4621_v59  ;;  %4482 = vmatprep.subr.bf16.mxu1 %v4622_v60  ;;  %v4650_v59 = vld [vmem:[%s5630_s30 + $0x1f8] sm:$0xff]  }
 0x1f3   : > { %v4651_v60 = vld [vmem:[%s5630_s30 + $0x138] sm:$0xff]   ;;  %s4657_s30 = sshll.u32 %s4720_s26, 4  ;;  %s4658_s30 = int_to_ptr.vmem [resolvable:$false] %s4657_s30 }
 0x1f4   : > { %s4659_s6 = scalar_lea.vmem %s4658_s30, 512  ;;  %p4660_p4 = scmp.lt.s32.totalorder %s3930_s17, %s4658_s30 }
 0x1f5   : > { %p4661_p5 = scmp.lt.s32.totalorder %s4659_s6, %s4653_s25 }
 0x1f7   : > { %p4662_p7 = por %p4661_p5, %p4660_p4 }
 0x1f9   : > { %p4663_p10 = pnand %p4662_p7, %p4656_p3 }
 0x217   : > { %v2807_v6 = vpop.f32.mrb[0].mxu0  ;;  %v2930_v12 = vpop.f32.mrb[0].mxu1 }
 0x218   : > { %v4504_v11 = vadd.f32 %v2807_v6, %v1166_v5  ;;  %v2809_v61 = vpop.f32.mrb[1].mxu0  ;;  %v4506_v13 = vadd.f32 %v2930_v12, %v1174_v46  ;;  %v2932_v16 = vpop.f32.mrb[1].mxu1  ;;  %v1190_v5 = vrot.slane %v5792_v63, %v1189_v1  ;;  %v1186_v46 = vrot.slane %v5792_v63, %v1185_v2 }
 0x219   : > { %v4505_v14 = vadd.f32 %v2809_v61, %v1170_v57  ;;  %v2811_v17 = vpop.f32.mrb[2].mxu0  ;;  %v4507_v18 = vadd.f32 %v2932_v16, %v1178_v10  ;;  %v2934_v19 = vpop.f32.mrb[2].mxu1  ;;  %v1194_v57 = vrot.slane %v5792_v63, %v1193_v3 }
 0x21a   : > { %v2812_v20 = vpop.f32.mrb[3].mxu0  ;;  %v2935_v7 = vpop.f32.mrb[3].mxu1  ;;  %v3229_v23 = vpack.c.bf16 %v4504_v11, %v4504_v11  ;;  %v3231_v28 = vpack.c.bf16 %v4506_v13, %v4506_v13 }
 0x21b   : > { %v3191_v8 = vcombine.low %v4504_v11, %v4505_v14  ;;  %v3230_v21 = vpack.c.bf16 %v4505_v14, %v4505_v14  ;;  %v3192_v25 = vcombine.low %v4506_v13, %v4507_v18  ;;  %v3232_v24 = vpack.c.bf16 %v4507_v18, %v4507_v18 }
 0x21d   : > { %v3199_v29 = vrot.slane %v3191_v8, %v5802_v15  ;;  %3781 = vmatprep.mubr.bf16.mxu0 %v3230_v21  ;;  %v3206_v32 = vrot.slane %v3192_v25, %v5802_v15  ;;  %3821 = vmatprep.mubr.bf16.mxu1 %v3232_v24 }
 0x21e   : > { %3782 = vmatmul.mubr.bf16.vlgmr.msra.gmra.mrb[8].mxu0 %v3229_v23  ;;  %3822 = vmatmul.mubr.bf16.vlgmr.msra.gmra.mrb[8].mxu1 %v3231_v28 }
 0x21f   : > { %4461 = vmatpush3.bf16.msra.mxu0 %v4623_v22  ;;  %v3207_v34 = vcombine.low %v3199_v29, %v3206_v32  ;;  %4483 = vmatpush3.bf16.msra.mxu1 %v4624_v26 }
 0x220   : > { %4462 = vmatprep.subr.bf16.mxu0 %v4625_v27  ;;  %4484 = vmatprep.subr.bf16.mxu1 %v4626_v31 }
 0x221   : > { %3227 = vst [vmem:[%s5815_s11] sm:$0xff] %v3207_v34 }
 0x223   : > { %4463 = vmatpush3.bf16.msra.mxu0 %v4627_v33  ;;  %4485 = vmatpush3.bf16.msra.mxu1 %v4628_v36 }
 0x224   : > { %4464 = vmatprep.subr.bf16.mxu0 %v4629_v37  ;;  %4486 = vmatprep.subr.bf16.mxu1 %v4630_v30 }
 0x227   : > { %4465 = vmatpush3.bf16.msra.mxu0 %v4631_v38  ;;  %4487 = vmatpush3.bf16.msra.mxu1 %v4632_v39 }
 0x228   : > { %4466 = vmatprep.subr.bf16.mxu0 %v4633_v40  ;;  %4488 = vmatprep.subr.bf16.mxu1 %v4634_v41 }
 0x22b   : > { %4467 = vmatpush3.bf16.msra.mxu0 %v4635_v42  ;;  %4489 = vmatpush3.bf16.msra.mxu1 %v4636_v43 }
 0x22c   : > { %4468 = vmatprep.subr.bf16.mxu0 %v4637_v44  ;;  %4490 = vmatprep.subr.bf16.mxu1 %v4638_v45 }
 0x22f   : > { %4469 = vmatpush3.bf16.msra.mxu0 %v4639_v47  ;;  %4491 = vmatpush3.bf16.msra.mxu1 %v4640_v48 }
 0x230   : > { %4470 = vmatprep.subr.bf16.mxu0 %v4641_v49  ;;  %4492 = vmatprep.subr.bf16.mxu1 %v4642_v50 }
 0x233   : > { %4471 = vmatpush3.bf16.msra.mxu0 %v4643_v51  ;;  %4493 = vmatpush3.bf16.msra.mxu1 %v4644_v52 }
 0x234   : > { %4472 = vmatprep.subr.bf16.mxu0 %v4645_v53  ;;  %4494 = vmatprep.subr.bf16.mxu1 %v4646_v54 }
 0x237   : > { %4473 = vmatpush3.bf16.msra.mxu0 %v4647_v55  ;;  %4495 = vmatpush3.bf16.msra.mxu1 %v4648_v56 }
 0x238   : > { %4474 = vmatprep.subr.bf16.mxu0 %v4649_v58  ;;  %4496 = vmatprep.subr.bf16.mxu1 %v4650_v59 }
 0x23b   : > { %4475 = vmatpush3.bf16.msra.mxu0 %v4651_v60  ;;  %4497 = vmatpush3.bf16.msra.mxu1 %v4652_v62 }
 0x2a7   : > { %v3053_v9 = vpop.f32.mrb[4].mxu0  ;;  %v3176_v6 = vpop.f32.mrb[4].mxu1 }
 0x2a8   : > { %v4508_v10 = vadd.f32 %v3053_v9, %v1182_v4  ;;  %v3055_v11 = vpop.f32.mrb[5].mxu0  ;;  %v4510_v12 = vadd.f32 %v3176_v6, %v1190_v5  ;;  %v3178_v13 = vpop.f32.mrb[5].mxu1 }
 0x2a9   : > { %v4509_v61 = vadd.f32 %v3055_v11, %v1186_v46  ;;  %v3057_v14 = vpop.f32.mrb[6].mxu0  ;;  %v4511_v16 = vadd.f32 %v3178_v13, %v1194_v57  ;;  %v3180_v17 = vpop.f32.mrb[6].mxu1 }
 0x2aa   : > { %v3058_v35 = vpop.f32.mrb[7].mxu0  ;;  %v3181_v20 = vpop.f32.mrb[7].mxu1  ;;  %v3233_v8 = vpack.c.bf16 %v4508_v10, %v4508_v10  ;;  %v3235_v22 = vpack.c.bf16 %v4510_v12, %v4510_v12 }
 0x2ab   : > { %v3208_v18 = vcombine.low %v4508_v10, %v4509_v61  ;;  %v3234_v19 = vpack.c.bf16 %v4509_v61, %v4509_v61  ;;  %v3209_v21 = vcombine.low %v4510_v12, %v4511_v16  ;;  %v3236_v7 = vpack.c.bf16 %v4511_v16, %v4511_v16 }
 0x2ad   : > { %v3216_v63 = vrot.slane %v3208_v18, %v5802_v15  ;;  %3861 = vmatprep.mubr.bf16.mxu0 %v3234_v19  ;;  %v3223_v23 = vrot.slane %v3209_v21, %v5802_v15  ;;  %3901 = vmatprep.mubr.bf16.mxu1 %v3236_v7 }
 0x2ae   : > { %3862 = vmatmul.mubr.bf16.vlgmr.msra.gmra.mrb[12].mxu0 %v3233_v8  ;;  %3902 = vmatmul.mubr.bf16.vlgmr.msra.gmra.mrb[12].mxu1 %v3235_v22 }
 0x2af   : > { %v3224_v25 = vcombine.low %v3216_v63, %v3223_v23 }
 0x2b1   : > { %3228 = vst [vmem:[%s5815_s11 + $0x8] sm:$0xff] %v3224_v25 }
 0x2f1   : > { %v4432_v24 = vpop.f32.mrb[8].mxu0  ;;  %v4454_v26 = vpop.f32.mrb[8].mxu1 }
 0x2f2   : > { %v4433_v27 = vpop.f32.mrb[9].mxu0  ;;  %v4455_v29 = vpop.f32.mrb[9].mxu1 }
 0x2f3   : > { %v4434_v28 = vadd.f32 %v4433_v27, %v4432_v24  ;;  %v4435_v31 = vpop.f32.mrb[10].mxu0  ;;  %v4456_v32 = vadd.f32 %v4455_v29, %v4454_v26  ;;  %v4457_v33 = vpop.f32.mrb[10].mxu1 }
 0x2f4   : > { %v4436_v34 = vpop.f32.mrb[11].mxu0  ;;  %v4458_v36 = vpop.f32.mrb[11].mxu1 }
 0x2f5   : > { %v3824_v15 = vadd.f32 %v4456_v32, %v4434_v28 }
 0x2f6   : > { %4666 = shalt.err (!%p4663_p10)
}
 0x2f7   : > { %s4667_s12 = scalar_lea.hbm %s5855_s16, 256  ;;  %s4671_s9 = scalar_lea.hbm %s5903_s4, 512 }
 0x2f8   : > { %p4668_p11 = scmp.ne.s32.totalorder %s5855_s16, %s4667_s12  ;;  %p4672_p0 = scmp.lt.u32.totalorder %s5855_s16, %s5903_s4 }
 0x2f9   : > { %p4673_p1 = scmp.lt.u32.totalorder %s4671_s9, %s4667_s12  ;;  %p4675_p3 = scmp.lt.u32.totalorder %s4667_s12, %s5855_s16 }
 0x2fa   : > { %p4669_p12 = pnand %p4668_p11, %p4790_p6 }
 0x2fb   : > { %p4674_p2 = por %p4673_p1, %p4672_p0 }
 0x2fc   : > { %p4670_p13 = pneg %p4669_p12 }
 0x2fd   : > { %p4676_p4 = por %p4675_p3, %p4674_p2 }
 0x2ff   : > { %p4677_p5 = pnand %p4676_p4, %p4670_p13 }
 0x301   : > { %4680 = shalt.err (!%p4677_p5)
}
 0x302   : > { %4546 = dma.vmem_to_hbm [thread:$0]  (%p4790_p6), %s3930_s17, 256, %s5855_s16, %s3911_s23  }
 0x303   : > { %p867_p7 = scmp.lt.s32.totalorder %s4772_s22, 1 }
 0x305   : > { %s5916_s22 = smov (!%p867_p7, %s4772_s22), 1 }
 0x306   : > { %s4052_s13 = sshll.u32 %s5916_s22, 1 }
 0x307   : > { %s870_s15 = scalar_lea.vmem %s5904_s5, %s4052_s13 }
 0x381   : > { %v4476_v37 = vpop.f32.mrb[12].mxu0  ;;  %v4498_v30 = vpop.f32.mrb[12].mxu1 }
 0x382   : > { %v4477_v38 = vpop.f32.mrb[13].mxu0  ;;  %v4499_v40 = vpop.f32.mrb[13].mxu1 }
 0x383   : > { %v4478_v39 = vadd.f32 %v4477_v38, %v4476_v37  ;;  %v4479_v41 = vpop.f32.mrb[14].mxu0  ;;  %v4500_v42 = vadd.f32 %v4499_v40, %v4498_v30  ;;  %v4501_v43 = vpop.f32.mrb[14].mxu1 }
 0x384   : > { %v4480_v44 = vpop.f32.mrb[15].mxu0  ;;  %v4502_v47 = vpop.f32.mrb[15].mxu1 }
 0x385   : > { %v3864_v45 = vadd.f32 %v4478_v39, %v3824_v15 }
 0x387   : > { %v3904_v48 = vadd.f32 %v4500_v42, %v3864_v45 }
 0x389   : > { %3909 = vst [vmem:[%s870_s15] sm:$0x3] %v3904_v48 }
 0x38a PF: > { %s3944_s16 = sand.u32 1, %s4703_s18   ;;  %p4549_p6 = pnand %p4044_p9, %p4794_p8 }
 0x38b   : > { %s3945_s22 = scalar_lea.sflag [#allocation4], %s3944_s16 }
 0x38c   : > { %4698 = dma.done.wait (!%p4549_p6), %s3945_s22, 256  }
 0x38d   : > { %4700 = vsyncadd (!%p4549_p6), %s3945_s22, 4294967040  ;;  %p16_p10 = scmp.ge.s32.totalorder %s4776_s24, 4   ;;  %s5907_s18 = smov %s4707_s19 }
 0x38e   : > { %s5908_s19 = smov %s4711_s20  ;;  %s5909_s20 = smov %s4788_s27 }
 0x38f   : > { %s5910_s21 = smov %s4776_s24  ;;  %18 = sbr.rel (!%p16_p10) target bundleno = 3 (0x3), region = 117 }
 0x396   :  { %3957 = vsyncpa [#allocation4], 1 }
 0x397   :  { %3959 = vsyncpa [#allocation4 + $0x1], 1 }

</bundles_post_ra>
